<compile_context>
chip_gen: v6e
topology: v6e:2x2x1
jax: 0.10.0
libtpu: 0.0.40
codegen_flags: <defaults>
</compile_context>

<pallas_src>
import jax
import jax.numpy as jnp
from jax.experimental import pallas as pl
from jax.experimental.pallas import tpu as pltpu


def _round_up(x, m):
    return ((x + m - 1) // m) * m


def _make_lstm_kernel(num_layers: int, hidden: int, seq_len: int, bp: int):
    H = hidden
    G = 4 * H          # gates tile width; H=32 -> G=128 = exactly one lane tile
    BP = bp

    def kernel(*refs):
        # refs: x, [w_ih_l, w_hh_l, b_l] * L, fc_w, fc_b, out
        x_ref = refs[0]
        out_ref = refs[-1]
        p = refs[1:-1]
        w_ih_refs = [p[3 * l + 0] for l in range(num_layers)]   # l=0: (IP, G); l>0: (G, G)
        w_hh_refs = [p[3 * l + 1] for l in range(num_layers)]   # (G, G)
        b_refs = [p[3 * l + 2] for l in range(num_layers)]      # (1, G)
        fc_w_ref = p[3 * num_layers + 0]                        # (1, G)
        fc_b_ref = p[3 * num_layers + 1]                        # (1, 1)

        f32 = jnp.float32

        # ---- hoisted lane constants (built once; nothing re-broadcast in loop)
        lane = jax.lax.broadcasted_iota(jnp.int32, (BP, G), 1)
        is_g = (lane >= 2 * H) & (lane < 3 * H)          # g (candidate) block
        is_even_blk = (lane < H) | is_g                  # blocks 0 and 2 (i, g)
        out_scale = jnp.where(is_g, 1.0, 0.5).astype(f32)   # sigmoid(z)=0.5*tanh(z/2)+0.5
        out_off = jnp.where(is_g, 0.0, 0.5).astype(f32)
        mask_even = jnp.where(is_even_blk, 1.0, 0.0).astype(f32)

        # ---- layer-0 input projection hoisted off the serial chain:
        # one MXU push with M = T*BP; bias b0 folded in here.
        x_proj = (jnp.dot(x_ref[...], w_ih_refs[0][...],
                          preferred_element_type=f32)
                  + b_refs[0][...])                                  # (T*BP, G)

        # ---- loop-invariant bias loads for layers >= 1, broadcast once
        b_full = [None] + [jnp.broadcast_to(b_refs[l][...], (BP, G))
                           for l in range(1, num_layers)]

        zeros = jnp.zeros((BP, G), f32)
        hs = [zeros for _ in range(num_layers)]   # true h/c live in block 1
        cs = [zeros for _ in range(num_layers)]   # (lanes H:2H); rest don't-care

        # Fully unrolled time loop (T static and small); weights stream from
        # VMEM refs inside the loop (pre-loading them would blow the vreg budget).
        for t in range(seq_len):
            for l in range(num_layers):
                if l == 0:
                    gates = (jnp.dot(hs[0], w_hh_refs[0][...],
                                     preferred_element_type=f32)
                             + x_proj[t * BP:(t + 1) * BP, :])
                else:
                    gates = (jnp.dot(hs[l], w_hh_refs[l][...],
                                     preferred_element_type=f32)
                             + jnp.dot(hs[l - 1], w_ih_refs[l][...],
                                       preferred_element_type=f32)
                             + b_full[l])
                # One EUP tanh covers all 4 gates; i/f/o inputs are pre-scaled
                # by 0.5 in the packed weights (sigmoid via tanh).
                act = jnp.tanh(gates)
                a = act * out_scale + out_off        # [sig_i | sig_f | tanh_g | sig_o]
                # 2H rotation swaps blocks 0<->2 and 1<->3 (its own inverse,
                # so roll direction is irrelevant).
                a_sw = pltpu.roll(a, 2 * H, axis=1)  # [g | o | i | f]
                # i*g appears at blocks 0 and 2; masked fold-by-H copies it to
                # every block regardless of roll direction.
                ig = a * a_sw * mask_even
                ig = ig + pltpu.roll(ig, H, axis=1)
                # Block 1 carries the real state: c = f*c + i*g ; h = o*tanh(c).
                # Other blocks hold bounded garbage that only ever multiplies
                # zero weight rows / zero fc lanes, so it never leaks.
                c_new = a * cs[l] + ig
                h_new = a_sw * jnp.tanh(c_new)
                cs[l] = c_new
                hs[l] = h_new

        # fc(H,1) + tanh as a VPU multiply + XLU lane reduce (no N=1 MXU pass).
        h_last = hs[-1]
        out = jnp.tanh(jnp.sum(h_last * fc_w_ref[...], axis=1, keepdims=True)
                       + fc_b_ref[...])
        out_ref[...] = out

    return kernel


def init_params(key, input_size, hidden_size, num_layers):
    """Deterministic init matching PyTorch's default U(-1/sqrt(H), 1/sqrt(H))."""
    H = hidden_size
    stdv = 1.0 / float(H) ** 0.5
    layers = []
    for l in range(num_layers):
        in_l = input_size if l == 0 else H
        key, k1, k2, k3, k4 = jax.random.split(key, 5)
        layers.append(dict(
            w_ih=jax.random.uniform(k1, (4 * H, in_l), jnp.float32, -stdv, stdv),
            w_hh=jax.random.uniform(k2, (4 * H, H), jnp.float32, -stdv, stdv),
            b_ih=jax.random.uniform(k3, (4 * H,), jnp.float32, -stdv, stdv),
            b_hh=jax.random.uniform(k4, (4 * H,), jnp.float32, -stdv, stdv),
        ))
    key, k1, k2 = jax.random.split(key, 3)
    fc_w = jax.random.uniform(k1, (1, H), jnp.float32, -stdv, stdv)
    fc_b = jax.random.uniform(k2, (1,), jnp.float32, -stdv, stdv)
    return dict(layers=layers, fc_w=fc_w, fc_b=fc_b)


def pack_params(params, input_size):
    """One-time packing of PyTorch-layout params into the dense fused layout.

    Gates packed densely: gate k (PyTorch order i, f, g, o) at lanes
    k*H:(k+1)*H of a 4*H-wide tile; i/f/o columns pre-scaled by 0.5 (sigmoid
    via tanh).  The hidden/cell state live at block 1 (lanes H:2H), so only
    rows H:2H of W_hh / W_ih (for layers > 0) are nonzero; layer 0's W_ih
    consumes the dense lane-0-based input.  b = b_ih + b_hh, same scale.
    """
    H = params['layers'][0]['w_hh'].shape[1]
    L = len(params['layers'])
    G = 4 * H
    IP = _round_up(input_size, 8)

    w_ih_list, w_hh_list, b_list = [], [], []
    for l, p in enumerate(params['layers']):
        in_l = p['w_ih'].shape[1]
        if l == 0:
            k_in, row_off = IP, 0
        else:
            k_in, row_off = G, H
        W_ih = jnp.zeros((k_in, G), jnp.float32)
        W_hh = jnp.zeros((G, G), jnp.float32)
        bias = jnp.zeros((1, G), jnp.float32)
        for k in range(4):                    # PyTorch gate order: i, f, g, o
            s = 1.0 if k == 2 else 0.5        # fold sigmoid-via-tanh 0.5 scale
            W_ih = W_ih.at[row_off:row_off + in_l, k * H:(k + 1) * H].set(
                p['w_ih'][k * H:(k + 1) * H, :].T * s)
            W_hh = W_hh.at[H:2 * H, k * H:(k + 1) * H].set(
                p['w_hh'][k * H:(k + 1) * H, :].T * s)
            bias = bias.at[0, k * H:(k + 1) * H].set(
                (p['b_ih'][k * H:(k + 1) * H] + p['b_hh'][k * H:(k + 1) * H]) * s)
        w_ih_list.append(W_ih)
        w_hh_list.append(W_hh)
        b_list.append(bias)

    fc_w = jnp.zeros((1, G), jnp.float32).at[0, H:2 * H].set(params['fc_w'][0])
    fc_b = params['fc_b'].reshape(1, 1).astype(jnp.float32)
    return dict(w_ih=w_ih_list, w_hh=w_hh_list, b=b_list,
                fc_w=fc_w, fc_b=fc_b, H=H, G=G, IP=IP, L=L)


def lstm_forward(x, packed):
    # x: (B, T, input_size) float32, batch-first like the PyTorch module.
    B, T, input_size = x.shape
    H, IP, L = packed['H'], packed['IP'], packed['L']
    BP = max(_round_up(B, 8), 8)          # pad batch to a full f32 sublane tile

    # Time-major, batch/lane padded: (T*BP, IP).  Padded rows/lanes are zeros
    # and the matching weight rows are zero, so they contribute nothing.
    xt = jnp.transpose(x, (1, 0, 2)).astype(jnp.float32)
    xt = jnp.pad(xt, ((0, 0), (0, BP - B), (0, IP - input_size)))
    xt = xt.reshape(T * BP, IP)

    args = [xt]
    for l in range(L):
        args += [packed['w_ih'][l], packed['w_hh'][l], packed['b'][l]]
    args += [packed['fc_w'], packed['fc_b']]

    kernel = _make_lstm_kernel(L, H, T, BP)
    vmem = pl.BlockSpec(memory_space=pltpu.MemorySpace.VMEM)
    # TODO(synk): if H/L ever scale so the resident weights exceed scoped VMEM
    # (16/32 MiB default; v7x 64 MiB physical), switch per-layer weights to
    # pl.ANY + pltpu.emit_pipeline streaming and set vmem_limit_bytes.
    # TODO(synk): at larger B, add a leading batch grid axis with
    # dimension_semantics=("parallel",) so v7x's two TensorCores are both used.
    out = pl.pallas_call(
        kernel,
        out_shape=jax.ShapeDtypeStruct((BP, 1), jnp.float32),
        in_specs=[vmem] * len(args),
        out_specs=vmem,
    )(*args)
    return out[:B]


def lstm_reference(x, params):
    """Pure-JAX reference matching torch.nn.LSTM(batch_first=True) + fc + tanh."""
    B, T, _ = x.shape
    H = params['layers'][0]['w_hh'].shape[1]
    L = len(params['layers'])
    h = [jnp.zeros((B, H), jnp.float32) for _ in range(L)]
    c = [jnp.zeros((B, H), jnp.float32) for _ in range(L)]
    for t in range(T):
        inp = x[:, t, :]
        for l in range(L):
            p = params['layers'][l]
            gates = inp @ p['w_ih'].T + p['b_ih'] + h[l] @ p['w_hh'].T + p['b_hh']
            i = jax.nn.sigmoid(gates[:, 0 * H:1 * H])
            f = jax.nn.sigmoid(gates[:, 1 * H:2 * H])
            g = jnp.tanh(gates[:, 2 * H:3 * H])
            o = jax.nn.sigmoid(gates[:, 3 * H:4 * H])
            c[l] = f * c[l] + i * g
            h[l] = o * jnp.tanh(c[l])
            inp = h[l]
    return jnp.tanh(h[-1] @ params['fc_w'].T + params['fc_b'])


if __name__ == "__main__":
    B, T, INPUT_SIZE, HIDDEN, LAYERS = 2, 8, 4, 32, 2

    key = jax.random.PRNGKey(0)
    key, xk = jax.random.split(key)
    x = jax.random.normal(xk, (B, T, INPUT_SIZE), jnp.float32)
    params = init_params(key, INPUT_SIZE, HIDDEN, LAYERS)
    packed = pack_params(params, INPUT_SIZE)

    out = lstm_forward(x, packed)
    out = jax.block_until_ready(out)

    ref = lstm_reference(x, params)
    assert out.shape == (B, 1), out.shape
    # sigmoid-via-tanh rewrite is exact; only rounding drift vs the reference.
    assert jnp.allclose(out, ref, atol=1e-4, rtol=1e-4), (out, ref)

    print("KERNEL_OK")
</pallas_src>

<mosaic_0001>
module attributes {stable_mosaic.version = 11 : i64} {
  func.func @kernel(%arg0: memref<64x8xf32, #tpu.memory_space<vmem>>, %arg1: memref<8x128xf32, #tpu.memory_space<vmem>>, %arg2: memref<128x128xf32, #tpu.memory_space<vmem>>, %arg3: memref<1x128xf32, #tpu.memory_space<vmem>>, %arg4: memref<128x128xf32, #tpu.memory_space<vmem>>, %arg5: memref<128x128xf32, #tpu.memory_space<vmem>>, %arg6: memref<1x128xf32, #tpu.memory_space<vmem>>, %arg7: memref<1x128xf32, #tpu.memory_space<vmem>>, %arg8: memref<1x1xf32, #tpu.memory_space<vmem>>, %arg9: memref<8x1xf32, #tpu.memory_space<vmem>>) attributes {dimension_semantics = [], scalar_prefetch = 0 : i64, scratch_operands = 0 : i64, tpu.core_type = #tpu.core_type<tc>} {
    %0 = tpu.iota {dimensions = array<i32: 1>} : vector<8x128xi32>
    %c64_i32 = arith.constant 64 : i32
    %1 = vector.broadcast %c64_i32 : i32 to vector<8x128xi32>
    %2 = arith.cmpi sge, %0, %1 : vector<8x128xi32>
    %c96_i32 = arith.constant 96 : i32
    %3 = vector.broadcast %c96_i32 : i32 to vector<8x128xi32>
    %4 = arith.cmpi slt, %0, %3 : vector<8x128xi32>
    %5 = arith.andi %2, %4 : vector<8x128xi1>
    %c32_i32 = arith.constant 32 : i32
    %6 = vector.broadcast %c32_i32 : i32 to vector<8x128xi32>
    %7 = arith.cmpi slt, %0, %6 : vector<8x128xi32>
    %8 = arith.ori %7, %5 : vector<8x128xi1>
    %cst = arith.constant 1.000000e+00 : f32
    %cst_0 = arith.constant 5.000000e-01 : f32
    %9 = vector.broadcast %cst : f32 to vector<8x128xf32>
    %10 = vector.broadcast %cst_0 : f32 to vector<8x128xf32>
    %11 = arith.select %5, %9, %10 : vector<8x128xi1>, vector<8x128xf32>
    %cst_1 = arith.constant 0.000000e+00 : f32
    %cst_2 = arith.constant 5.000000e-01 : f32
    %12 = vector.broadcast %cst_1 : f32 to vector<8x128xf32>
    %13 = vector.broadcast %cst_2 : f32 to vector<8x128xf32>
    %14 = arith.select %5, %12, %13 : vector<8x128xi1>, vector<8x128xf32>
    %cst_3 = arith.constant 1.000000e+00 : f32
    %cst_4 = arith.constant 0.000000e+00 : f32
    %15 = vector.broadcast %cst_3 : f32 to vector<8x128xf32>
    %16 = vector.broadcast %cst_4 : f32 to vector<8x128xf32>
    %17 = arith.select %8, %15, %16 : vector<8x128xi1>, vector<8x128xf32>
    %c0 = arith.constant 0 : index
    %c0_5 = arith.constant 0 : index
    %18 = vector.load %arg0[%c0, %c0_5] : memref<64x8xf32, #tpu.memory_space<vmem>>, vector<64x8xf32>
    %c0_6 = arith.constant 0 : index
    %c0_7 = arith.constant 0 : index
    %19 = vector.load %arg1[%c0_6, %c0_7] : memref<8x128xf32, #tpu.memory_space<vmem>>, vector<8x128xf32>
    %cst_8 = arith.constant dense<0.000000e+00> : vector<64x128xf32>
    %20 = tpu.matmul %18, %19, %cst_8 {dimension_numbers = #tpu.dot_dimension_numbers<[1], [0], [0], [1], [0, 0, 1, 1], [], []>} : vector<64x8xf32>, vector<8x128xf32>, vector<64x128xf32> -> vector<64x128xf32>
    %c0_9 = arith.constant 0 : index
    %c0_10 = arith.constant 0 : index
    %21 = vector.load %arg3[%c0_9, %c0_10] : memref<1x128xf32, #tpu.memory_space<vmem>>, vector<1x128xf32>
    %22 = vector.broadcast %21 : vector<1x128xf32> to vector<64x128xf32>
    %23 = arith.addf %20, %22 : vector<64x128xf32>
    %c0_11 = arith.constant 0 : index
    %c0_12 = arith.constant 0 : index
    %24 = vector.load %arg6[%c0_11, %c0_12] : memref<1x128xf32, #tpu.memory_space<vmem>>, vector<1x128xf32>
    %25 = vector.shape_cast %24 : vector<1x128xf32> to vector<1x128xf32>
    %26 = vector.broadcast %25 : vector<1x128xf32> to vector<8x128xf32>
    %cst_13 = arith.constant 0.000000e+00 : f32
    %27 = vector.broadcast %cst_13 : f32 to vector<8x128xf32>
    %c0_14 = arith.constant 0 : index
    %c0_15 = arith.constant 0 : index
    %28 = vector.load %arg2[%c0_14, %c0_15] : memref<128x128xf32, #tpu.memory_space<vmem>>, vector<128x128xf32>
    %cst_16 = arith.constant dense<0.000000e+00> : vector<8x128xf32>
    %29 = tpu.matmul %27, %28, %cst_16 {dimension_numbers = #tpu.dot_dimension_numbers<[1], [0], [0], [1], [0, 0, 1, 1], [], []>} : vector<8x128xf32>, vector<128x128xf32>, vector<8x128xf32> -> vector<8x128xf32>
    %30 = vector.extract_strided_slice %23 {offsets = [0, 0], sizes = [8, 128], strides = [1, 1]} : vector<64x128xf32> to vector<8x128xf32>
    %31 = arith.addf %29, %30 : vector<8x128xf32>
    %32 = math.tanh %31 : vector<8x128xf32>
    %33 = arith.mulf %32, %11 : vector<8x128xf32>
    %34 = arith.addf %33, %14 : vector<8x128xf32>
    %c64_i32_17 = arith.constant 64 : i32
    %35 = tpu.dynamic_rotate %34 by %c64_i32_17 dim 1 : vector<8x128xf32>, i32 -> vector<8x128xf32>
    %36 = arith.mulf %34, %35 : vector<8x128xf32>
    %37 = arith.mulf %36, %17 : vector<8x128xf32>
    %c32_i32_18 = arith.constant 32 : i32
    %38 = tpu.dynamic_rotate %37 by %c32_i32_18 dim 1 : vector<8x128xf32>, i32 -> vector<8x128xf32>
    %39 = arith.addf %37, %38 : vector<8x128xf32>
    %40 = arith.mulf %34, %27 : vector<8x128xf32>
    %41 = arith.addf %40, %39 : vector<8x128xf32>
    %42 = math.tanh %41 : vector<8x128xf32>
    %43 = arith.mulf %35, %42 : vector<8x128xf32>
    %c0_19 = arith.constant 0 : index
    %c0_20 = arith.constant 0 : index
    %44 = vector.load %arg5[%c0_19, %c0_20] : memref<128x128xf32, #tpu.memory_space<vmem>>, vector<128x128xf32>
    %cst_21 = arith.constant dense<0.000000e+00> : vector<8x128xf32>
    %45 = tpu.matmul %27, %44, %cst_21 {dimension_numbers = #tpu.dot_dimension_numbers<[1], [0], [0], [1], [0, 0, 1, 1], [], []>} : vector<8x128xf32>, vector<128x128xf32>, vector<8x128xf32> -> vector<8x128xf32>
    %c0_22 = arith.constant 0 : index
    %c0_23 = arith.constant 0 : index
    %46 = vector.load %arg4[%c0_22, %c0_23] : memref<128x128xf32, #tpu.memory_space<vmem>>, vector<128x128xf32>
    %cst_24 = arith.constant dense<0.000000e+00> : vector<8x128xf32>
    %47 = tpu.matmul %43, %46, %cst_24 {dimension_numbers = #tpu.dot_dimension_numbers<[1], [0], [0], [1], [0, 0, 1, 1], [], []>} : vector<8x128xf32>, vector<128x128xf32>, vector<8x128xf32> -> vector<8x128xf32>
    %48 = arith.addf %45, %47 : vector<8x128xf32>
    %49 = arith.addf %48, %26 : vector<8x128xf32>
    %50 = math.tanh %49 : vector<8x128xf32>
    %51 = arith.mulf %50, %11 : vector<8x128xf32>
    %52 = arith.addf %51, %14 : vector<8x128xf32>
    %c64_i32_25 = arith.constant 64 : i32
    %53 = tpu.dynamic_rotate %52 by %c64_i32_25 dim 1 : vector<8x128xf32>, i32 -> vector<8x128xf32>
    %54 = arith.mulf %52, %53 : vector<8x128xf32>
    %55 = arith.mulf %54, %17 : vector<8x128xf32>
    %c32_i32_26 = arith.constant 32 : i32
    %56 = tpu.dynamic_rotate %55 by %c32_i32_26 dim 1 : vector<8x128xf32>, i32 -> vector<8x128xf32>
    %57 = arith.addf %55, %56 : vector<8x128xf32>
    %58 = arith.mulf %52, %27 : vector<8x128xf32>
    %59 = arith.addf %58, %57 : vector<8x128xf32>
    %60 = math.tanh %59 : vector<8x128xf32>
    %61 = arith.mulf %53, %60 : vector<8x128xf32>
    %c0_27 = arith.constant 0 : index
    %c0_28 = arith.constant 0 : index
    %62 = vector.load %arg2[%c0_27, %c0_28] : memref<128x128xf32, #tpu.memory_space<vmem>>, vector<128x128xf32>
    %cst_29 = arith.constant dense<0.000000e+00> : vector<8x128xf32>
    %63 = tpu.matmul %43, %62, %cst_29 {dimension_numbers = #tpu.dot_dimension_numbers<[1], [0], [0], [1], [0, 0, 1, 1], [], []>} : vector<8x128xf32>, vector<128x128xf32>, vector<8x128xf32> -> vector<8x128xf32>
    %64 = vector.extract_strided_slice %23 {offsets = [8, 0], sizes = [8, 128], strides = [1, 1]} : vector<64x128xf32> to vector<8x128xf32>
    %65 = arith.addf %63, %64 : vector<8x128xf32>
    %66 = math.tanh %65 : vector<8x128xf32>
    %67 = arith.mulf %66, %11 : vector<8x128xf32>
    %68 = arith.addf %67, %14 : vector<8x128xf32>
    %c64_i32_30 = arith.constant 64 : i32
    %69 = tpu.dynamic_rotate %68 by %c64_i32_30 dim 1 : vector<8x128xf32>, i32 -> vector<8x128xf32>
    %70 = arith.mulf %68, %69 : vector<8x128xf32>
    %71 = arith.mulf %70, %17 : vector<8x128xf32>
    %c32_i32_31 = arith.constant 32 : i32
    %72 = tpu.dynamic_rotate %71 by %c32_i32_31 dim 1 : vector<8x128xf32>, i32 -> vector<8x128xf32>
    %73 = arith.addf %71, %72 : vector<8x128xf32>
    %74 = arith.mulf %68, %41 : vector<8x128xf32>
    %75 = arith.addf %74, %73 : vector<8x128xf32>
    %76 = math.tanh %75 : vector<8x128xf32>
    %77 = arith.mulf %69, %76 : vector<8x128xf32>
    %c0_32 = arith.constant 0 : index
    %c0_33 = arith.constant 0 : index
    %78 = vector.load %arg5[%c0_32, %c0_33] : memref<128x128xf32, #tpu.memory_space<vmem>>, vector<128x128xf32>
    %cst_34 = arith.constant dense<0.000000e+00> : vector<8x128xf32>
    %79 = tpu.matmul %61, %78, %cst_34 {dimension_numbers = #tpu.dot_dimension_numbers<[1], [0], [0], [1], [0, 0, 1, 1], [], []>} : vector<8x128xf32>, vector<128x128xf32>, vector<8x128xf32> -> vector<8x128xf32>
    %c0_35 = arith.constant 0 : index
    %c0_36 = arith.constant 0 : index
    %80 = vector.load %arg4[%c0_35, %c0_36] : memref<128x128xf32, #tpu.memory_space<vmem>>, vector<128x128xf32>
    %cst_37 = arith.constant dense<0.000000e+00> : vector<8x128xf32>
    %81 = tpu.matmul %77, %80, %cst_37 {dimension_numbers = #tpu.dot_dimension_numbers<[1], [0], [0], [1], [0, 0, 1, 1], [], []>} : vector<8x128xf32>, vector<128x128xf32>, vector<8x128xf32> -> vector<8x128xf32>
    %82 = arith.addf %79, %81 : vector<8x128xf32>
    %83 = arith.addf %82, %26 : vector<8x128xf32>
    %84 = math.tanh %83 : vector<8x128xf32>
    %85 = arith.mulf %84, %11 : vector<8x128xf32>
    %86 = arith.addf %85, %14 : vector<8x128xf32>
    %c64_i32_38 = arith.constant 64 : i32
    %87 = tpu.dynamic_rotate %86 by %c64_i32_38 dim 1 : vector<8x128xf32>, i32 -> vector<8x128xf32>
    %88 = arith.mulf %86, %87 : vector<8x128xf32>
    %89 = arith.mulf %88, %17 : vector<8x128xf32>
    %c32_i32_39 = arith.constant 32 : i32
    %90 = tpu.dynamic_rotate %89 by %c32_i32_39 dim 1 : vector<8x128xf32>, i32 -> vector<8x128xf32>
    %91 = arith.addf %89, %90 : vector<8x128xf32>
    %92 = arith.mulf %86, %59 : vector<8x128xf32>
    %93 = arith.addf %92, %91 : vector<8x128xf32>
    %94 = math.tanh %93 : vector<8x128xf32>
    %95 = arith.mulf %87, %94 : vector<8x128xf32>
    %c0_40 = arith.constant 0 : index
    %c0_41 = arith.constant 0 : index
    %96 = vector.load %arg2[%c0_40, %c0_41] : memref<128x128xf32, #tpu.memory_space<vmem>>, vector<128x128xf32>
    %cst_42 = arith.constant dense<0.000000e+00> : vector<8x128xf32>
    %97 = tpu.matmul %77, %96, %cst_42 {dimension_numbers = #tpu.dot_dimension_numbers<[1], [0], [0], [1], [0, 0, 1, 1], [], []>} : vector<8x128xf32>, vector<128x128xf32>, vector<8x128xf32> -> vector<8x128xf32>
    %98 = vector.extract_strided_slice %23 {offsets = [16, 0], sizes = [8, 128], strides = [1, 1]} : vector<64x128xf32> to vector<8x128xf32>
    %99 = arith.addf %97, %98 : vector<8x128xf32>
    %100 = math.tanh %99 : vector<8x128xf32>
    %101 = arith.mulf %100, %11 : vector<8x128xf32>
    %102 = arith.addf %101, %14 : vector<8x128xf32>
    %c64_i32_43 = arith.constant 64 : i32
    %103 = tpu.dynamic_rotate %102 by %c64_i32_43 dim 1 : vector<8x128xf32>, i32 -> vector<8x128xf32>
    %104 = arith.mulf %102, %103 : vector<8x128xf32>
    %105 = arith.mulf %104, %17 : vector<8x128xf32>
    %c32_i32_44 = arith.constant 32 : i32
    %106 = tpu.dynamic_rotate %105 by %c32_i32_44 dim 1 : vector<8x128xf32>, i32 -> vector<8x128xf32>
    %107 = arith.addf %105, %106 : vector<8x128xf32>
    %108 = arith.mulf %102, %75 : vector<8x128xf32>
    %109 = arith.addf %108, %107 : vector<8x128xf32>
    %110 = math.tanh %109 : vector<8x128xf32>
    %111 = arith.mulf %103, %110 : vector<8x128xf32>
    %c0_45 = arith.constant 0 : index
    %c0_46 = arith.constant 0 : index
    %112 = vector.load %arg5[%c0_45, %c0_46] : memref<128x128xf32, #tpu.memory_space<vmem>>, vector<128x128xf32>
    %cst_47 = arith.constant dense<0.000000e+00> : vector<8x128xf32>
    %113 = tpu.matmul %95, %112, %cst_47 {dimension_numbers = #tpu.dot_dimension_numbers<[1], [0], [0], [1], [0, 0, 1, 1], [], []>} : vector<8x128xf32>, vector<128x128xf32>, vector<8x128xf32> -> vector<8x128xf32>
    %c0_48 = arith.constant 0 : index
    %c0_49 = arith.constant 0 : index
    %114 = vector.load %arg4[%c0_48, %c0_49] : memref<128x128xf32, #tpu.memory_space<vmem>>, vector<128x128xf32>
    %cst_50 = arith.constant dense<0.000000e+00> : vector<8x128xf32>
    %115 = tpu.matmul %111, %114, %cst_50 {dimension_numbers = #tpu.dot_dimension_numbers<[1], [0], [0], [1], [0, 0, 1, 1], [], []>} : vector<8x128xf32>, vector<128x128xf32>, vector<8x128xf32> -> vector<8x128xf32>
    %116 = arith.addf %113, %115 : vector<8x128xf32>
    %117 = arith.addf %116, %26 : vector<8x128xf32>
    %118 = math.tanh %117 : vector<8x128xf32>
    %119 = arith.mulf %118, %11 : vector<8x128xf32>
    %120 = arith.addf %119, %14 : vector<8x128xf32>
    %c64_i32_51 = arith.constant 64 : i32
    %121 = tpu.dynamic_rotate %120 by %c64_i32_51 dim 1 : vector<8x128xf32>, i32 -> vector<8x128xf32>
    %122 = arith.mulf %120, %121 : vector<8x128xf32>
    %123 = arith.mulf %122, %17 : vector<8x128xf32>
    %c32_i32_52 = arith.constant 32 : i32
    %124 = tpu.dynamic_rotate %123 by %c32_i32_52 dim 1 : vector<8x128xf32>, i32 -> vector<8x128xf32>
    %125 = arith.addf %123, %124 : vector<8x128xf32>
    %126 = arith.mulf %120, %93 : vector<8x128xf32>
    %127 = arith.addf %126, %125 : vector<8x128xf32>
    %128 = math.tanh %127 : vector<8x128xf32>
    %129 = arith.mulf %121, %128 : vector<8x128xf32>
    %c0_53 = arith.constant 0 : index
    %c0_54 = arith.constant 0 : index
    %130 = vector.load %arg2[%c0_53, %c0_54] : memref<128x128xf32, #tpu.memory_space<vmem>>, vector<128x128xf32>
    %cst_55 = arith.constant dense<0.000000e+00> : vector<8x128xf32>
    %131 = tpu.matmul %111, %130, %cst_55 {dimension_numbers = #tpu.dot_dimension_numbers<[1], [0], [0], [1], [0, 0, 1, 1], [], []>} : vector<8x128xf32>, vector<128x128xf32>, vector<8x128xf32> -> vector<8x128xf32>
    %132 = vector.extract_strided_slice %23 {offsets = [24, 0], sizes = [8, 128], strides = [1, 1]} : vector<64x128xf32> to vector<8x128xf32>
    %133 = arith.addf %131, %132 : vector<8x128xf32>
    %134 = math.tanh %133 : vector<8x128xf32>
    %135 = arith.mulf %134, %11 : vector<8x128xf32>
    %136 = arith.addf %135, %14 : vector<8x128xf32>
    %c64_i32_56 = arith.constant 64 : i32
    %137 = tpu.dynamic_rotate %136 by %c64_i32_56 dim 1 : vector<8x128xf32>, i32 -> vector<8x128xf32>
    %138 = arith.mulf %136, %137 : vector<8x128xf32>
    %139 = arith.mulf %138, %17 : vector<8x128xf32>
    %c32_i32_57 = arith.constant 32 : i32
    %140 = tpu.dynamic_rotate %139 by %c32_i32_57 dim 1 : vector<8x128xf32>, i32 -> vector<8x128xf32>
    %141 = arith.addf %139, %140 : vector<8x128xf32>
    %142 = arith.mulf %136, %109 : vector<8x128xf32>
    %143 = arith.addf %142, %141 : vector<8x128xf32>
    %144 = math.tanh %143 : vector<8x128xf32>
    %145 = arith.mulf %137, %144 : vector<8x128xf32>
    %c0_58 = arith.constant 0 : index
    %c0_59 = arith.constant 0 : index
    %146 = vector.load %arg5[%c0_58, %c0_59] : memref<128x128xf32, #tpu.memory_space<vmem>>, vector<128x128xf32>
    %cst_60 = arith.constant dense<0.000000e+00> : vector<8x128xf32>
    %147 = tpu.matmul %129, %146, %cst_60 {dimension_numbers = #tpu.dot_dimension_numbers<[1], [0], [0], [1], [0, 0, 1, 1], [], []>} : vector<8x128xf32>, vector<128x128xf32>, vector<8x128xf32> -> vector<8x128xf32>
    %c0_61 = arith.constant 0 : index
    %c0_62 = arith.constant 0 : index
    %148 = vector.load %arg4[%c0_61, %c0_62] : memref<128x128xf32, #tpu.memory_space<vmem>>, vector<128x128xf32>
    %cst_63 = arith.constant dense<0.000000e+00> : vector<8x128xf32>
    %149 = tpu.matmul %145, %148, %cst_63 {dimension_numbers = #tpu.dot_dimension_numbers<[1], [0], [0], [1], [0, 0, 1, 1], [], []>} : vector<8x128xf32>, vector<128x128xf32>, vector<8x128xf32> -> vector<8x128xf32>
    %150 = arith.addf %147, %149 : vector<8x128xf32>
    %151 = arith.addf %150, %26 : vector<8x128xf32>
    %152 = math.tanh %151 : vector<8x128xf32>
    %153 = arith.mulf %152, %11 : vector<8x128xf32>
    %154 = arith.addf %153, %14 : vector<8x128xf32>
    %c64_i32_64 = arith.constant 64 : i32
    %155 = tpu.dynamic_rotate %154 by %c64_i32_64 dim 1 : vector<8x128xf32>, i32 -> vector<8x128xf32>
    %156 = arith.mulf %154, %155 : vector<8x128xf32>
    %157 = arith.mulf %156, %17 : vector<8x128xf32>
    %c32_i32_65 = arith.constant 32 : i32
    %158 = tpu.dynamic_rotate %157 by %c32_i32_65 dim 1 : vector<8x128xf32>, i32 -> vector<8x128xf32>
    %159 = arith.addf %157, %158 : vector<8x128xf32>
    %160 = arith.mulf %154, %127 : vector<8x128xf32>
    %161 = arith.addf %160, %159 : vector<8x128xf32>
    %162 = math.tanh %161 : vector<8x128xf32>
    %163 = arith.mulf %155, %162 : vector<8x128xf32>
    %c0_66 = arith.constant 0 : index
    %c0_67 = arith.constant 0 : index
    %164 = vector.load %arg2[%c0_66, %c0_67] : memref<128x128xf32, #tpu.memory_space<vmem>>, vector<128x128xf32>
    %cst_68 = arith.constant dense<0.000000e+00> : vector<8x128xf32>
    %165 = tpu.matmul %145, %164, %cst_68 {dimension_numbers = #tpu.dot_dimension_numbers<[1], [0], [0], [1], [0, 0, 1, 1], [], []>} : vector<8x128xf32>, vector<128x128xf32>, vector<8x128xf32> -> vector<8x128xf32>
    %166 = vector.extract_strided_slice %23 {offsets = [32, 0], sizes = [8, 128], strides = [1, 1]} : vector<64x128xf32> to vector<8x128xf32>
    %167 = arith.addf %165, %166 : vector<8x128xf32>
    %168 = math.tanh %167 : vector<8x128xf32>
    %169 = arith.mulf %168, %11 : vector<8x128xf32>
    %170 = arith.addf %169, %14 : vector<8x128xf32>
    %c64_i32_69 = arith.constant 64 : i32
    %171 = tpu.dynamic_rotate %170 by %c64_i32_69 dim 1 : vector<8x128xf32>, i32 -> vector<8x128xf32>
    %172 = arith.mulf %170, %171 : vector<8x128xf32>
    %173 = arith.mulf %172, %17 : vector<8x128xf32>
    %c32_i32_70 = arith.constant 32 : i32
    %174 = tpu.dynamic_rotate %173 by %c32_i32_70 dim 1 : vector<8x128xf32>, i32 -> vector<8x128xf32>
    %175 = arith.addf %173, %174 : vector<8x128xf32>
    %176 = arith.mulf %170, %143 : vector<8x128xf32>
    %177 = arith.addf %176, %175 : vector<8x128xf32>
    %178 = math.tanh %177 : vector<8x128xf32>
    %179 = arith.mulf %171, %178 : vector<8x128xf32>
    %c0_71 = arith.constant 0 : index
    %c0_72 = arith.constant 0 : index
    %180 = vector.load %arg5[%c0_71, %c0_72] : memref<128x128xf32, #tpu.memory_space<vmem>>, vector<128x128xf32>
    %cst_73 = arith.constant dense<0.000000e+00> : vector<8x128xf32>
    %181 = tpu.matmul %163, %180, %cst_73 {dimension_numbers = #tpu.dot_dimension_numbers<[1], [0], [0], [1], [0, 0, 1, 1], [], []>} : vector<8x128xf32>, vector<128x128xf32>, vector<8x128xf32> -> vector<8x128xf32>
    %c0_74 = arith.constant 0 : index
    %c0_75 = arith.constant 0 : index
    %182 = vector.load %arg4[%c0_74, %c0_75] : memref<128x128xf32, #tpu.memory_space<vmem>>, vector<128x128xf32>
    %cst_76 = arith.constant dense<0.000000e+00> : vector<8x128xf32>
    %183 = tpu.matmul %179, %182, %cst_76 {dimension_numbers = #tpu.dot_dimension_numbers<[1], [0], [0], [1], [0, 0, 1, 1], [], []>} : vector<8x128xf32>, vector<128x128xf32>, vector<8x128xf32> -> vector<8x128xf32>
    %184 = arith.addf %181, %183 : vector<8x128xf32>
    %185 = arith.addf %184, %26 : vector<8x128xf32>
    %186 = math.tanh %185 : vector<8x128xf32>
    %187 = arith.mulf %186, %11 : vector<8x128xf32>
    %188 = arith.addf %187, %14 : vector<8x128xf32>
    %c64_i32_77 = arith.constant 64 : i32
    %189 = tpu.dynamic_rotate %188 by %c64_i32_77 dim 1 : vector<8x128xf32>, i32 -> vector<8x128xf32>
    %190 = arith.mulf %188, %189 : vector<8x128xf32>
    %191 = arith.mulf %190, %17 : vector<8x128xf32>
    %c32_i32_78 = arith.constant 32 : i32
    %192 = tpu.dynamic_rotate %191 by %c32_i32_78 dim 1 : vector<8x128xf32>, i32 -> vector<8x128xf32>
    %193 = arith.addf %191, %192 : vector<8x128xf32>
    %194 = arith.mulf %188, %161 : vector<8x128xf32>
    %195 = arith.addf %194, %193 : vector<8x128xf32>
    %196 = math.tanh %195 : vector<8x128xf32>
    %197 = arith.mulf %189, %196 : vector<8x128xf32>
    %c0_79 = arith.constant 0 : index
    %c0_80 = arith.constant 0 : index
    %198 = vector.load %arg2[%c0_79, %c0_80] : memref<128x128xf32, #tpu.memory_space<vmem>>, vector<128x128xf32>
    %cst_81 = arith.constant dense<0.000000e+00> : vector<8x128xf32>
    %199 = tpu.matmul %179, %198, %cst_81 {dimension_numbers = #tpu.dot_dimension_numbers<[1], [0], [0], [1], [0, 0, 1, 1], [], []>} : vector<8x128xf32>, vector<128x128xf32>, vector<8x128xf32> -> vector<8x128xf32>
    %200 = vector.extract_strided_slice %23 {offsets = [40, 0], sizes = [8, 128], strides = [1, 1]} : vector<64x128xf32> to vector<8x128xf32>
    %201 = arith.addf %199, %200 : vector<8x128xf32>
    %202 = math.tanh %201 : vector<8x128xf32>
    %203 = arith.mulf %202, %11 : vector<8x128xf32>
    %204 = arith.addf %203, %14 : vector<8x128xf32>
    %c64_i32_82 = arith.constant 64 : i32
    %205 = tpu.dynamic_rotate %204 by %c64_i32_82 dim 1 : vector<8x128xf32>, i32 -> vector<8x128xf32>
    %206 = arith.mulf %204, %205 : vector<8x128xf32>
    %207 = arith.mulf %206, %17 : vector<8x128xf32>
    %c32_i32_83 = arith.constant 32 : i32
    %208 = tpu.dynamic_rotate %207 by %c32_i32_83 dim 1 : vector<8x128xf32>, i32 -> vector<8x128xf32>
    %209 = arith.addf %207, %208 : vector<8x128xf32>
    %210 = arith.mulf %204, %177 : vector<8x128xf32>
    %211 = arith.addf %210, %209 : vector<8x128xf32>
    %212 = math.tanh %211 : vector<8x128xf32>
    %213 = arith.mulf %205, %212 : vector<8x128xf32>
    %c0_84 = arith.constant 0 : index
    %c0_85 = arith.constant 0 : index
    %214 = vector.load %arg5[%c0_84, %c0_85] : memref<128x128xf32, #tpu.memory_space<vmem>>, vector<128x128xf32>
    %cst_86 = arith.constant dense<0.000000e+00> : vector<8x128xf32>
    %215 = tpu.matmul %197, %214, %cst_86 {dimension_numbers = #tpu.dot_dimension_numbers<[1], [0], [0], [1], [0, 0, 1, 1], [], []>} : vector<8x128xf32>, vector<128x128xf32>, vector<8x128xf32> -> vector<8x128xf32>
    %c0_87 = arith.constant 0 : index
    %c0_88 = arith.constant 0 : index
    %216 = vector.load %arg4[%c0_87, %c0_88] : memref<128x128xf32, #tpu.memory_space<vmem>>, vector<128x128xf32>
    %cst_89 = arith.constant dense<0.000000e+00> : vector<8x128xf32>
    %217 = tpu.matmul %213, %216, %cst_89 {dimension_numbers = #tpu.dot_dimension_numbers<[1], [0], [0], [1], [0, 0, 1, 1], [], []>} : vector<8x128xf32>, vector<128x128xf32>, vector<8x128xf32> -> vector<8x128xf32>
    %218 = arith.addf %215, %217 : vector<8x128xf32>
    %219 = arith.addf %218, %26 : vector<8x128xf32>
    %220 = math.tanh %219 : vector<8x128xf32>
    %221 = arith.mulf %220, %11 : vector<8x128xf32>
    %222 = arith.addf %221, %14 : vector<8x128xf32>
    %c64_i32_90 = arith.constant 64 : i32
    %223 = tpu.dynamic_rotate %222 by %c64_i32_90 dim 1 : vector<8x128xf32>, i32 -> vector<8x128xf32>
    %224 = arith.mulf %222, %223 : vector<8x128xf32>
    %225 = arith.mulf %224, %17 : vector<8x128xf32>
    %c32_i32_91 = arith.constant 32 : i32
    %226 = tpu.dynamic_rotate %225 by %c32_i32_91 dim 1 : vector<8x128xf32>, i32 -> vector<8x128xf32>
    %227 = arith.addf %225, %226 : vector<8x128xf32>
    %228 = arith.mulf %222, %195 : vector<8x128xf32>
    %229 = arith.addf %228, %227 : vector<8x128xf32>
    %230 = math.tanh %229 : vector<8x128xf32>
    %231 = arith.mulf %223, %230 : vector<8x128xf32>
    %c0_92 = arith.constant 0 : index
    %c0_93 = arith.constant 0 : index
    %232 = vector.load %arg2[%c0_92, %c0_93] : memref<128x128xf32, #tpu.memory_space<vmem>>, vector<128x128xf32>
    %cst_94 = arith.constant dense<0.000000e+00> : vector<8x128xf32>
    %233 = tpu.matmul %213, %232, %cst_94 {dimension_numbers = #tpu.dot_dimension_numbers<[1], [0], [0], [1], [0, 0, 1, 1], [], []>} : vector<8x128xf32>, vector<128x128xf32>, vector<8x128xf32> -> vector<8x128xf32>
    %234 = vector.extract_strided_slice %23 {offsets = [48, 0], sizes = [8, 128], strides = [1, 1]} : vector<64x128xf32> to vector<8x128xf32>
    %235 = arith.addf %233, %234 : vector<8x128xf32>
    %236 = math.tanh %235 : vector<8x128xf32>
    %237 = arith.mulf %236, %11 : vector<8x128xf32>
    %238 = arith.addf %237, %14 : vector<8x128xf32>
    %c64_i32_95 = arith.constant 64 : i32
    %239 = tpu.dynamic_rotate %238 by %c64_i32_95 dim 1 : vector<8x128xf32>, i32 -> vector<8x128xf32>
    %240 = arith.mulf %238, %239 : vector<8x128xf32>
    %241 = arith.mulf %240, %17 : vector<8x128xf32>
    %c32_i32_96 = arith.constant 32 : i32
    %242 = tpu.dynamic_rotate %241 by %c32_i32_96 dim 1 : vector<8x128xf32>, i32 -> vector<8x128xf32>
    %243 = arith.addf %241, %242 : vector<8x128xf32>
    %244 = arith.mulf %238, %211 : vector<8x128xf32>
    %245 = arith.addf %244, %243 : vector<8x128xf32>
    %246 = math.tanh %245 : vector<8x128xf32>
    %247 = arith.mulf %239, %246 : vector<8x128xf32>
    %c0_97 = arith.constant 0 : index
    %c0_98 = arith.constant 0 : index
    %248 = vector.load %arg5[%c0_97, %c0_98] : memref<128x128xf32, #tpu.memory_space<vmem>>, vector<128x128xf32>
    %cst_99 = arith.constant dense<0.000000e+00> : vector<8x128xf32>
    %249 = tpu.matmul %231, %248, %cst_99 {dimension_numbers = #tpu.dot_dimension_numbers<[1], [0], [0], [1], [0, 0, 1, 1], [], []>} : vector<8x128xf32>, vector<128x128xf32>, vector<8x128xf32> -> vector<8x128xf32>
    %c0_100 = arith.constant 0 : index
    %c0_101 = arith.constant 0 : index
    %250 = vector.load %arg4[%c0_100, %c0_101] : memref<128x128xf32, #tpu.memory_space<vmem>>, vector<128x128xf32>
    %cst_102 = arith.constant dense<0.000000e+00> : vector<8x128xf32>
    %251 = tpu.matmul %247, %250, %cst_102 {dimension_numbers = #tpu.dot_dimension_numbers<[1], [0], [0], [1], [0, 0, 1, 1], [], []>} : vector<8x128xf32>, vector<128x128xf32>, vector<8x128xf32> -> vector<8x128xf32>
    %252 = arith.addf %249, %251 : vector<8x128xf32>
    %253 = arith.addf %252, %26 : vector<8x128xf32>
    %254 = math.tanh %253 : vector<8x128xf32>
    %255 = arith.mulf %254, %11 : vector<8x128xf32>
    %256 = arith.addf %255, %14 : vector<8x128xf32>
    %c64_i32_103 = arith.constant 64 : i32
    %257 = tpu.dynamic_rotate %256 by %c64_i32_103 dim 1 : vector<8x128xf32>, i32 -> vector<8x128xf32>
    %258 = arith.mulf %256, %257 : vector<8x128xf32>
    %259 = arith.mulf %258, %17 : vector<8x128xf32>
    %c32_i32_104 = arith.constant 32 : i32
    %260 = tpu.dynamic_rotate %259 by %c32_i32_104 dim 1 : vector<8x128xf32>, i32 -> vector<8x128xf32>
    %261 = arith.addf %259, %260 : vector<8x128xf32>
    %262 = arith.mulf %256, %229 : vector<8x128xf32>
    %263 = arith.addf %262, %261 : vector<8x128xf32>
    %264 = math.tanh %263 : vector<8x128xf32>
    %265 = arith.mulf %257, %264 : vector<8x128xf32>
    %c0_105 = arith.constant 0 : index
    %c0_106 = arith.constant 0 : index
    %266 = vector.load %arg2[%c0_105, %c0_106] : memref<128x128xf32, #tpu.memory_space<vmem>>, vector<128x128xf32>
    %cst_107 = arith.constant dense<0.000000e+00> : vector<8x128xf32>
    %267 = tpu.matmul %247, %266, %cst_107 {dimension_numbers = #tpu.dot_dimension_numbers<[1], [0], [0], [1], [0, 0, 1, 1], [], []>} : vector<8x128xf32>, vector<128x128xf32>, vector<8x128xf32> -> vector<8x128xf32>
    %268 = vector.extract_strided_slice %23 {offsets = [56, 0], sizes = [8, 128], strides = [1, 1]} : vector<64x128xf32> to vector<8x128xf32>
    %269 = arith.addf %267, %268 : vector<8x128xf32>
    %270 = math.tanh %269 : vector<8x128xf32>
    %271 = arith.mulf %270, %11 : vector<8x128xf32>
    %272 = arith.addf %271, %14 : vector<8x128xf32>
    %c64_i32_108 = arith.constant 64 : i32
    %273 = tpu.dynamic_rotate %272 by %c64_i32_108 dim 1 : vector<8x128xf32>, i32 -> vector<8x128xf32>
    %274 = arith.mulf %272, %273 : vector<8x128xf32>
    %275 = arith.mulf %274, %17 : vector<8x128xf32>
    %c32_i32_109 = arith.constant 32 : i32
    %276 = tpu.dynamic_rotate %275 by %c32_i32_109 dim 1 : vector<8x128xf32>, i32 -> vector<8x128xf32>
    %277 = arith.addf %275, %276 : vector<8x128xf32>
    %278 = arith.mulf %272, %245 : vector<8x128xf32>
    %279 = arith.addf %278, %277 : vector<8x128xf32>
    %280 = math.tanh %279 : vector<8x128xf32>
    %281 = arith.mulf %273, %280 : vector<8x128xf32>
    %c0_110 = arith.constant 0 : index
    %c0_111 = arith.constant 0 : index
    %282 = vector.load %arg5[%c0_110, %c0_111] : memref<128x128xf32, #tpu.memory_space<vmem>>, vector<128x128xf32>
    %cst_112 = arith.constant dense<0.000000e+00> : vector<8x128xf32>
    %283 = tpu.matmul %265, %282, %cst_112 {dimension_numbers = #tpu.dot_dimension_numbers<[1], [0], [0], [1], [0, 0, 1, 1], [], []>} : vector<8x128xf32>, vector<128x128xf32>, vector<8x128xf32> -> vector<8x128xf32>
    %c0_113 = arith.constant 0 : index
    %c0_114 = arith.constant 0 : index
    %284 = vector.load %arg4[%c0_113, %c0_114] : memref<128x128xf32, #tpu.memory_space<vmem>>, vector<128x128xf32>
    %cst_115 = arith.constant dense<0.000000e+00> : vector<8x128xf32>
    %285 = tpu.matmul %281, %284, %cst_115 {dimension_numbers = #tpu.dot_dimension_numbers<[1], [0], [0], [1], [0, 0, 1, 1], [], []>} : vector<8x128xf32>, vector<128x128xf32>, vector<8x128xf32> -> vector<8x128xf32>
    %286 = arith.addf %283, %285 : vector<8x128xf32>
    %287 = arith.addf %286, %26 : vector<8x128xf32>
    %288 = math.tanh %287 : vector<8x128xf32>
    %289 = arith.mulf %288, %11 : vector<8x128xf32>
    %290 = arith.addf %289, %14 : vector<8x128xf32>
    %c64_i32_116 = arith.constant 64 : i32
    %291 = tpu.dynamic_rotate %290 by %c64_i32_116 dim 1 : vector<8x128xf32>, i32 -> vector<8x128xf32>
    %292 = arith.mulf %290, %291 : vector<8x128xf32>
    %293 = arith.mulf %292, %17 : vector<8x128xf32>
    %c32_i32_117 = arith.constant 32 : i32
    %294 = tpu.dynamic_rotate %293 by %c32_i32_117 dim 1 : vector<8x128xf32>, i32 -> vector<8x128xf32>
    %295 = arith.addf %293, %294 : vector<8x128xf32>
    %296 = arith.mulf %290, %263 : vector<8x128xf32>
    %297 = arith.addf %296, %295 : vector<8x128xf32>
    %298 = math.tanh %297 : vector<8x128xf32>
    %299 = arith.mulf %291, %298 : vector<8x128xf32>
    %c0_118 = arith.constant 0 : index
    %c0_119 = arith.constant 0 : index
    %300 = vector.load %arg7[%c0_118, %c0_119] : memref<1x128xf32, #tpu.memory_space<vmem>>, vector<1x128xf32>
    %301 = vector.broadcast %300 : vector<1x128xf32> to vector<8x128xf32>
    %302 = arith.mulf %299, %301 : vector<8x128xf32>
    %cst_120 = arith.constant dense<0.000000e+00> : vector<8xf32>
    %303 = vector.multi_reduction <add>, %302, %cst_120 [1] : vector<8x128xf32> to vector<8xf32>
    %304 = vector.shape_cast %303 : vector<8xf32> to vector<8x1xf32>
    %c0_121 = arith.constant 0 : index
    %c0_122 = arith.constant 0 : index
    %305 = vector.load %arg8[%c0_121, %c0_122] : memref<1x1xf32, #tpu.memory_space<vmem>>, vector<1x1xf32>
    %306 = vector.broadcast %305 : vector<1x1xf32> to vector<8x1xf32>
    %307 = arith.addf %304, %306 : vector<8x1xf32>
    %308 = math.tanh %307 : vector<8x1xf32>
    %c0_123 = arith.constant 0 : index
    %c0_124 = arith.constant 0 : index
    %309 = vector.load %arg9[%c0_123, %c0_124] : memref<8x1xf32, #tpu.memory_space<vmem>>, vector<8x1xf32>
    tpu.vector_store %arg9[%c0_123, %c0_124], %308 {strides = array<i32>} : memref<8x1xf32, #tpu.memory_space<vmem>>, vector<8x1xf32>,
    return
  }
}

</mosaic_0001>

<bundles_post_ra>
// kernel: tpu_custom_call.1
= control target key start
LH: loop header
LB: loop body
LE: loop exit
PB: predicated region body
PF: predicated region fallthrough
CT: control target
= control target key end

     0   :  { %s5065_s0 = inlined_call_operand.vmem [shape: f32[64,8], index: 0, kind: input, shape index: {}]   ;;  %s5066_s1 = inlined_call_operand.vmem [shape: f32[8,128], index: 1, kind: input, shape index: {}]   ;;  %s5067_s2 = inlined_call_operand.hbm [shape: f32[128,128], index: 2, kind: input, shape index: {}]   ;;  %s5068_s3 = inlined_call_operand.vmem [shape: f32[1,128], index: 3, kind: input, shape index: {}]   ;;  %s5069_s4 = inlined_call_operand.hbm [shape: f32[128,128], index: 4, kind: input, shape index: {}]   ;;  %s5070_s5 = inlined_call_operand.hbm [shape: f32[128,128], index: 5, kind: input, shape index: {}]   ;;  %s5071_s6 = inlined_call_operand.vmem [shape: f32[1,128], index: 6, kind: input, shape index: {}]   ;;  %s5072_s7 = inlined_call_operand.vmem [shape: f32[1,128], index: 7, kind: input, shape index: {}]   ;;  %s5073_s8 = inlined_call_operand.<no memory space> [shape: f32[1,1], index: 8, kind: input, shape index: {}]   ;;  %s5074_s9 = inlined_call_operand.vmem [shape: f32[8,1], index: 9, kind: output, shape index: {}]  }
   0x1   :  { %v14_v0 = vstv %s5073_s8 }
   0x2   :  { %15 = vst [vmem:[#allocation2] sm:$0x1] %v14_v0 }
   0x3   :  { %16 = vsyncpa [#allocation4], 0 }
   0x4   :  { %17 = vsyncpa [#allocation6], 0  ;;  %s3699_s11 = smov [#allocation5]   ;;  %s3700_s13 = smov [#allocation3]  }
   0x5   :  { %s41_s12 = sshll.u32 %s3699_s11, 4  ;;  %s27_s14 = sshll.u32 %s3700_s13, 4  ;;  %s42_s12 = int_to_ptr.vmem [resolvable:$true] %s41_s12  ;;  %s28_s14 = int_to_ptr.vmem [resolvable:$true] %s27_s14 }
   0x6   :  { %s3643_s15 = scalar_lea.vmem %s42_s12, 2048  ;;  %p3648_p1 = scmp.lt.s32.totalorder %s42_s12, %s42_s12 }
   0x7   :  { %p3644_p0 = scmp.ne.s32.totalorder %s42_s12, %s3643_s15  ;;  %p3649_p2 = scmp.lt.s32.totalorder %s3643_s15, %s3643_s15 }
   0x9   :  { %p3650_p3 = por %p3649_p2, %p3648_p1 }
   0xb   :  { %p3651_p4 = pnand %p3650_p3, %p3644_p0 }
   0xd   :  { %3654 = shalt.err (!%p3651_p4)
}
   0xe   :  { %s3701_s16 = smov 128   ;;  %s3702_s17 = smov 8  }
   0xf   :  { %47 = dma.hbm_to_vmem [thread:$0]  %s5069_s4, 2048, %s42_s12, [#allocation6], %s3701_s16, %s3701_s16, %s3702_s17  }
  0x10   :  { %s3663_s19 = scalar_lea.vmem %s28_s14, 2048  ;;  %p3668_p6 = scmp.lt.s32.totalorder %s28_s14, %s28_s14 }
  0x11   :  { %p3664_p5 = scmp.ne.s32.totalorder %s28_s14, %s3663_s19  ;;  %p3669_p7 = scmp.lt.s32.totalorder %s3663_s19, %s3663_s19 }
  0x13   :  { %p3670_p8 = por %p3669_p7, %p3668_p6 }
  0x15   :  { %p3671_p9 = pnand %p3670_p8, %p3664_p5 }
  0x17   :  { %3674 = shalt.err (!%p3671_p9)
}
  0x18   :  { %33 = dma.hbm_to_vmem [thread:$0]  %s5067_s2, 2048, %s28_s14, [#allocation4], %s3701_s16, %s3701_s16, %s3702_s17  }
  0x19   :  { %s3703_s22 = smov [#allocation7]  }
  0x1a   :  { %s53_s23 = sshll.u32 %s3703_s22, 4  ;;  %s54_s23 = int_to_ptr.vmem [resolvable:$true] %s53_s23 }
  0x1b   :  { %s3683_s24 = scalar_lea.vmem %s54_s23, 2048  ;;  %p3688_p11 = scmp.lt.s32.totalorder %s54_s23, %s54_s23 }
  0x1c   :  { %p3684_p10 = scmp.ne.s32.totalorder %s54_s23, %s3683_s24  ;;  %p3689_p12 = scmp.lt.s32.totalorder %s3683_s24, %s3683_s24 }
  0x1e   :  { %p3690_p13 = por %p3689_p12, %p3688_p11 }
  0x20   :  { %p3691_p0 = pnand %p3690_p13, %p3684_p10 }
  0x22   :  { %3694 = shalt.err (!%p3691_p0)
}
  0x23   :  { %59 = dma.hbm_to_vmem [thread:$0]  %s5070_s5, 2048, %s54_s23, [#allocation6], %s3701_s16, %s3701_s16, %s3702_s17  }
  0x24   :  { %3695 = dma.done.wait [#allocation4], 2048  }
  0x25   :  { %3696 = vsyncadd [#allocation4], 4294965248 }
  0x26   :  { %3697 = dma.done.wait [#allocation6], 4096  }
  0x27   :  { %3698 = vsyncadd [#allocation6], 4294963200  ;;  %v5077_v1 = vmov 0.0   ;;  %vm3705_vm0 = vmmov 0   ;;  %v3774_v2 = vld [vmem:[#allocation3 + $0x78] sm:$0xff]  ;;  %v3776_v3 = vld [vmem:[#allocation3 + $0x70] sm:$0xff]  ;;  %v75_v21 = vlaneseq }
  0x28   :  { %2668 = vmatprep.subr.mxu1 %v5077_v1  ;;  %2700 = vmatprep.mubr.msk.f32.mxu1 %vm3705_vm0, %v5077_v1  ;;  %v3780_v4 = vld [vmem:[#allocation3 + $0x68] sm:$0xff]  ;;  %v3784_v5 = vld [vmem:[#allocation3 + $0x60] sm:$0xff]  ;;  %vm101_vm1 = vcmask 64512   ;;  %v3797_v9 = vld [vmem:[#allocation3 + $0x58] sm:$0xff]  ;;  %v3706_v36 = vmov 0.5   ;;  %s3707_s10 = smov 64  }
  0x29   :  { %2669 = vmatpush3.msra.mxu1 %v3774_v2  ;;  %v93_v6 = vld [vmem:[%s5066_s1] sm:$0xff]  ;;  %v86_v8 = vld [vmem:[%s5065_s0 + $0x8] sm:$0xff]  ;;  %v3802_v10 = vld [vmem:[#allocation3 + $0x50] sm:$0xff]  ;;  %v76_v22 = vand.u32 127, %v75_v21  ;;  %s3708_s20 = smov 32   ;;  %vm2217_vm7 = vcmask 7168  }
  0x2a   :  { %2670 = vmatprep.subr.mxu1 %v5077_v1  ;;  %v85_v7 = vld [vmem:[%s5065_s0] sm:$0xff]  ;;  %2654 = vmatprep.subr.mxu0 %v93_v6  ;;  %v3808_v11 = vld [vmem:[#allocation3 + $0x48] sm:$0xff]  ;;  %v3820_v14 = vld [vmem:[#allocation3 + $0x30] sm:$0xff] }
  0x2b   :  { %2671 = vmatpush3.msra.mxu1 %v3776_v3  ;;  %2655 = vmatpush3.msra.mxu0 %v93_v6  ;;  %v3812_v12 = vld [vmem:[#allocation3 + $0x40] sm:$0xff]  ;;  %v3816_v13 = vld [vmem:[#allocation3 + $0x38] sm:$0xff]  ;;  %v3824_v15 = vld [vmem:[#allocation3 + $0x28] sm:$0xff]  ;;  %vm77_vm2 = vcmp.ge.s32.totalorder %v76_v22, 64  ;;  %vm78_vm3 = vcmp.lt.s32.totalorder %v76_v22, 96  ;;  %vm80_vm5 = vcmp.lt.s32.totalorder %v76_v22, 32 }
  0x2c   :  { %2672 = vmatprep.subr.mxu1 %v5077_v1  ;;  %2656 = vmatprep.mubr.msk.f32.mxu0 %vm101_vm1, %v85_v7  ;;  %v3828_v16 = vld [vmem:[#allocation3 + $0x20] sm:$0xff]  ;;  %v3832_v17 = vld [vmem:[#allocation3 + $0x18] sm:$0xff]  ;;  %v3836_v18 = vld [vmem:[#allocation3 + $0x10] sm:$0xff] }
  0x2d   :  { %2673 = vmatpush3.msra.mxu1 %v3780_v4  ;;  %2657 = vmatmul.mubr.msk.f32.vlgmr.msra.gmra.mxu0 %vm101_vm1, %v86_v8  ;;  %v3840_v19 = vld [vmem:[#allocation3 + $0x8] sm:$0xff]  ;;  %v3844_v20 = vld [vmem:[#allocation3] sm:$0xff]  ;;  %vm3853_vm4 = vmand %vm77_vm2, %vm78_vm3 }
  0x2e   :  { %2674 = vmatprep.subr.mxu1 %v5077_v1  ;;  %2703 = vmatprep.subr.mxu0 %v5077_v1  ;;  %vm3859_vm6 = vmor %vm80_vm5, %vm3853_vm4  ;;  %v3868_v26 = vld [vmem:[%s5068_s3] ss:$0 sm:$0xff]  ;;  %v3875_v34 = vld [vmem:[#allocation5 + $0x70] sm:$0xff]  ;;  %v3883_v37 = vsel %vm3853_vm4, 1.0, %v3706_v36  ;;  %v3895_v41 = vsel %vm3853_vm4, 0.0, %v3706_v36 }
  0x2f   :  { %2675 = vmatpush3.msra.mxu1 %v3784_v5  ;;  %5114 = vst [vmem:[#allocation10_spill] sm:$0xff] %v3868_v26  ;;  %v3871_v32 = vld [vmem:[#allocation5 + $0x78] sm:$0xff]  ;;  %v3879_v35 = vld [vmem:[#allocation7 + $0x70] sm:$0xff]  ;;  %5115 = vst [vmem:[#allocation11_spill] sm:$0xff] %v3883_v37  ;;  %v3978_v62 = vsel %vm3859_vm6, 1.0, %v5077_v1 }
  0x30   :  { %2676 = vmatprep.subr.mxu1 %v5077_v1  ;;  %v3873_v33 = vld [vmem:[#allocation7 + $0x78] sm:$0xff]  ;;  %2704 = vmatpush3.msra.mxu0 %v3871_v32  ;;  %v3887_v38 = vld [vmem:[#allocation5 + $0x68] sm:$0xff]  ;;  %5116 = vst [vmem:[#allocation12_spill] sm:$0xff] %v3895_v41  ;;  %v3899_v42 = vld [vmem:[#allocation5 + $0x60] sm:$0xff] }
  0x31   :  { %2677 = vmatpush3.msra.mxu1 %v3797_v9  ;;  %2705 = vmatprep.subr.mxu0 %v5077_v1  ;;  %v3889_v39 = vld [vmem:[#allocation7 + $0x68] sm:$0xff]  ;;  %v3901_v43 = vld [vmem:[#allocation7 + $0x60] sm:$0xff]  ;;  %v3908_v45 = vld [vmem:[#allocation5 + $0x58] sm:$0xff] }
  0x32   :  { %2678 = vmatprep.subr.mxu1 %v5077_v1  ;;  %2706 = vmatpush3.msra.mxu0 %v3875_v34  ;;  %v3915_v47 = vld [vmem:[#allocation7 + $0x58] sm:$0xff]  ;;  %v3919_v48 = vld [vmem:[#allocation5 + $0x50] sm:$0xff]  ;;  %v3933_v50 = vld [vmem:[#allocation5 + $0x48] sm:$0xff] }
  0x33   :  { %2679 = vmatpush3.msra.mxu1 %v3802_v10  ;;  %2707 = vmatprep.subr.mxu0 %v5077_v1  ;;  %v3924_v49 = vld [vmem:[#allocation7 + $0x50] sm:$0xff]  ;;  %v3936_v51 = vld [vmem:[#allocation7 + $0x48] sm:$0xff]  ;;  %v3940_v52 = vld [vmem:[#allocation5 + $0x40] sm:$0xff] }
  0x34   :  { %2680 = vmatprep.subr.mxu1 %v5077_v1  ;;  %2708 = vmatpush3.msra.mxu0 %v3887_v38  ;;  %v3944_v53 = vld [vmem:[#allocation7 + $0x40] sm:$0xff]  ;;  %v3948_v54 = vld [vmem:[#allocation5 + $0x38] sm:$0xff]  ;;  %v87_v55 = vld [vmem:[%s5065_s0 + $0x10] sm:$0xff] }
  0x35   :  { %2681 = vmatpush3.msra.mxu1 %v3808_v11  ;;  %2709 = vmatprep.subr.mxu0 %v5077_v1  ;;  %v3955_v56 = vld [vmem:[#allocation7 + $0x38] sm:$0xff]  ;;  %v3962_v58 = vld [vmem:[#allocation5 + $0x30] sm:$0xff]  ;;  %v3968_v60 = vld [vmem:[#allocation5 + $0x28] sm:$0xff] }
  0x36   :  { %2682 = vmatprep.subr.mxu1 %v5077_v1  ;;  %2710 = vmatpush3.msra.mxu0 %v3899_v42  ;;  %v88_v57 = vld [vmem:[%s5065_s0 + $0x18] sm:$0xff]  ;;  %v89_v61 = vld [vmem:[%s5065_s0 + $0x20] sm:$0xff]  ;;  %v3984_v0 = vld [vmem:[#allocation7 + $0x28] sm:$0xff] }
  0x37   :  { %2683 = vmatpush3.msra.mxu1 %v3812_v12  ;;  %2711 = vmatprep.subr.mxu0 %v5077_v1  ;;  %v3964_v59 = vld [vmem:[#allocation7 + $0x30] sm:$0xff]  ;;  %5118 = vst [vmem:[#allocation14_spill] sm:$0xff] %v3984_v0  ;;  %v90_v6 = vld [vmem:[%s5065_s0 + $0x28] sm:$0xff]  ;;  %v4004_v23 = vld [vmem:[#allocation5 + $0x18] sm:$0xff] }
  0x38   :  { %2684 = vmatprep.subr.mxu1 %v5077_v1  ;;  %2712 = vmatpush3.msra.mxu0 %v3908_v45  ;;  %5117 = vst [vmem:[#allocation13_spill] sm:$0xff] %v3964_v59  ;;  %v3993_v8 = vld [vmem:[#allocation5 + $0x20] sm:$0xff]  ;;  %v91_v24 = vld [vmem:[%s5065_s0 + $0x30] sm:$0xff] }
  0x39   :  { %2685 = vmatpush3.msra.mxu1 %v3816_v13  ;;  %2713 = vmatprep.subr.mxu0 %v5077_v1  ;;  %v4002_v22 = vld [vmem:[#allocation7 + $0x20] sm:$0xff]  ;;  %v4033_v36 = vld [vmem:[#allocation7 + $0x8] sm:$0xff] }
  0x3a   :  { %2686 = vmatprep.subr.mxu1 %v5077_v1  ;;  %2714 = vmatpush3.msra.mxu0 %v3919_v48  ;;  %5119 = vst [vmem:[#allocation15_spill] sm:$0xff] %v4002_v22  ;;  %5122 = vst [vmem:[#allocation18_spill] sm:$0xff] %v4033_v36 }
  0x3b   :  { %2687 = vmatpush3.msra.mxu1 %v3820_v14  ;;  %2715 = vmatprep.subr.mxu0 %v5077_v1 }
  0x3c   :  { %2688 = vmatprep.subr.mxu1 %v5077_v1  ;;  %2716 = vmatpush3.msra.mxu0 %v3933_v50 }
  0x3d   :  { %2689 = vmatpush3.msra.mxu1 %v3824_v15  ;;  %2717 = vmatprep.subr.mxu0 %v5077_v1 }
  0x3e   :  { %2690 = vmatprep.subr.mxu1 %v5077_v1  ;;  %2718 = vmatpush3.msra.mxu0 %v3940_v52 }
  0x3f   :  { %2691 = vmatpush3.msra.mxu1 %v3828_v16  ;;  %2719 = vmatprep.subr.mxu0 %v5077_v1 }
  0x40   :  { %2692 = vmatprep.subr.mxu1 %v5077_v1  ;;  %2720 = vmatpush3.msra.mxu0 %v3948_v54 }
  0x41   :  { %2693 = vmatpush3.msra.mxu1 %v3832_v17  ;;  %2659 = vmatprep.mubr.msk.f32.mxu0 %vm101_vm1, %v87_v55 }
  0x42   :  { %2694 = vmatprep.subr.mxu1 %v5077_v1  ;;  %2721 = vmatprep.subr.mxu0 %v5077_v1 }
  0x43   :  { %2695 = vmatpush3.msra.mxu1 %v3836_v18  ;;  %2660 = vmatmul.mubr.msk.f32.gmra.mxu0 %vm101_vm1, %v88_v57 }
  0x44   :  { %2696 = vmatprep.subr.mxu1 %v5077_v1  ;;  %2722 = vmatpush3.msra.mxu0 %v3962_v58 }
  0x45   :  { %2697 = vmatpush3.msra.mxu1 %v3840_v19  ;;  %2723 = vmatprep.subr.mxu0 %v5077_v1 }
  0x46   :  { %2698 = vmatprep.subr.mxu1 %v5077_v1  ;;  %2724 = vmatpush3.msra.mxu0 %v3968_v60 }
  0x47   :  { %2699 = vmatpush3.msra.mxu1 %v3844_v20  ;;  %2662 = vmatprep.mubr.msk.f32.mxu0 %vm101_vm1, %v89_v61 }
  0x48   :  { %2701 = vmatmul.mubr.f32.vlgmr.msra.gmra.mxu1 %v5077_v1  ;;  %2738 = vmatprep.subr.mxu1 %v5077_v1 }
  0x49   :  { %2770 = vmatprep.mubr.msk.f32.mxu1 %vm3705_vm0, %v5077_v1  ;;  %2739 = vmatpush3.msra.mxu1 %v3873_v33 }
  0x4a   :  { %2740 = vmatprep.subr.mxu1 %v5077_v1  ;;  %2725 = vmatprep.subr.mxu0 %v5077_v1 }
  0x4b   :  { %2741 = vmatpush3.msra.mxu1 %v3879_v35  ;;  %2663 = vmatmul.mubr.msk.f32.gmra.mxu0 %vm101_vm1, %v90_v6 }
  0x4c   :  { %2742 = vmatprep.subr.mxu1 %v5077_v1  ;;  %2726 = vmatpush3.msra.mxu0 %v3993_v8 }
  0x4d   :  { %2743 = vmatpush3.msra.mxu1 %v3889_v39  ;;  %2727 = vmatprep.subr.mxu0 %v5077_v1 }
  0x4e   :  { %2744 = vmatprep.subr.mxu1 %v5077_v1  ;;  %2728 = vmatpush3.msra.mxu0 %v4004_v23 }
  0x4f   :  { %2745 = vmatpush3.msra.mxu1 %v3901_v43  ;;  %2665 = vmatprep.mubr.msk.f32.mxu0 %vm101_vm1, %v91_v24 }
  0x50   :  { %2746 = vmatprep.subr.mxu1 %v5077_v1  ;;  %2729 = vmatprep.subr.mxu0 %v5077_v1 }
  0x51   :  { %2747 = vmatpush3.msra.mxu1 %v3915_v47 }
  0x52   :  { %2748 = vmatprep.subr.mxu1 %v5077_v1 }
  0x53   :  { %2749 = vmatpush3.msra.mxu1 %v3924_v49 }
  0x54   :  { %2750 = vmatprep.subr.mxu1 %v5077_v1 }
  0x55   :  { %2751 = vmatpush3.msra.mxu1 %v3936_v51 }
  0x56   :  { %2752 = vmatprep.subr.mxu1 %v5077_v1 }
  0x57   :  { %2753 = vmatpush3.msra.mxu1 %v3944_v53 }
  0x58   :  { %2754 = vmatprep.subr.mxu1 %v5077_v1 }
  0x59   :  { %2755 = vmatpush3.msra.mxu1 %v3955_v56 }
  0x5a   :  { %2756 = vmatprep.subr.mxu1 %v5077_v1 }
  0x5b   :  { %2757 = vmatpush3.msra.mxu1 %v3964_v59 }
  0x5c   :  { %2758 = vmatprep.subr.mxu1 %v5077_v1 }
  0x5d   :  { %2759 = vmatpush3.msra.mxu1 %v3984_v0 }
  0x5e   :  { %2760 = vmatprep.subr.mxu1 %v5077_v1 }
  0x5f   :  { %2761 = vmatpush3.msra.mxu1 %v4002_v22 }
  0x60   :  { %2762 = vmatprep.subr.mxu1 %v5077_v1 }
  0xed   :  { %v3863_v25 = vpop.f32.mrf.mxu0 }
  0xef   :  { %v192_v27 = vpop.f32.mrf.mxu0 }
  0xf0   :  { %v193_v28 = vadd.f32 %v3868_v26, %v192_v27  ;;  %v4014_v27 = vld [vmem:[#allocation7 + $0x18] sm:$0xff] }
  0xf1   :  { %5120 = vst [vmem:[#allocation16_spill] sm:$0xff] %v4014_v27  ;;  %2763 = vmatpush3.msra.mxu1 %v4014_v27 }
  0xf2   :  { %2764 = vmatprep.subr.mxu1 %v5077_v1 }
 0x108   :  { %v320_v29 = vpop.f32.mrf.mxu1 }
 0x109   :  { %v321_v30 = vadd.f32 %v320_v29, %v193_v28  ;;  %v92_v28 = vld [vmem:[%s5065_s0 + $0x38] sm:$0xff] }
 0x10a   :  { %v2702_v31 = vpop.f32.mrf.mxu1  ;;  %v4023_v29 = vld [vmem:[#allocation5 + $0x10] sm:$0xff]  ;;  %2666 = vmatmul.mubr.msk.f32.gmra.mxu0 %vm101_vm1, %v92_v28 }
 0x10b   :  { %3518 = vtanh.f32 %v321_v30  ;;  %v4025_v30 = vld [vmem:[#allocation7 + $0x10] sm:$0xff]  ;;  %v4031_v31 = vld [vmem:[#allocation5 + $0x8] sm:$0xff]  ;;  %2730 = vmatpush3.msra.mxu0 %v4023_v29  ;;  %2735 = vmatprep.mubr.msk.f32.mxu0 %vm3705_vm0, %v5077_v1 }
 0x10c   :  { %5121 = vst [vmem:[#allocation17_spill] sm:$0xff] %v4025_v30  ;;  %2765 = vmatpush3.msra.mxu1 %v4025_v30  ;;  %2731 = vmatprep.subr.mxu0 %v5077_v1 }
 0x10d   :  { %2766 = vmatprep.subr.mxu1 %v5077_v1  ;;  %2732 = vmatpush3.msra.mxu0 %v4031_v31 }
 0x10e   :  { %2767 = vmatpush3.msra.mxu1 %v4033_v36  ;;  %2733 = vmatprep.subr.mxu0 %v5077_v1 }
 0x10f   :  { %2768 = vmatprep.subr.mxu1 %v5077_v1 }
 0x118   :  { %v3519_v40 = vpop.eup %3518 }
 0x119   :  { %v325_v44 = vmul.f32 %v3519_v40, %v3883_v37  ;;  %v4039_v40 = vld [vmem:[#allocation5] sm:$0xff] }
 0x11a   :  { %2734 = vmatpush3.msra.mxu0 %v4039_v40 }
 0x11b   :  { %v3911_v46 = vadd.f32 %v325_v44, %v3895_v41  ;;  %v4043_v44 = vld [vmem:[#allocation7] sm:$0xff]  ;;  %2773 = vmatprep.subr.mxu0 %v5077_v1 }
 0x11c   :  { %5123 = vst [vmem:[#allocation19_spill] sm:$0xff] %v4043_v44  ;;  %2769 = vmatpush3.msra.mxu1 %v4043_v44 }
 0x11d   :  { %327 = vrot.lane.b32.xlu0 %v3911_v46, %s3707_s10  ;;  %2771 = vmatmul.mubr.f32.vlgmr.msra.gmra.mxu1 %v5077_v1  ;;  %v334_v61 = vmul.f32 0.0, %v3911_v46 }
 0x11e   :  { %2808 = vmatprep.subr.mxu1 %v5077_v1  ;;  %2840 = vmatprep.mubr.msk.f32.mxu1 %vm3705_vm0, %v5077_v1 }
 0x11f   :  { %2809 = vmatpush3.msra.mxu1 %v3871_v32 }
 0x120   :  { %2810 = vmatprep.subr.mxu1 %v5077_v1 }
 0x121   :  { %2811 = vmatpush3.msra.mxu1 %v3875_v34 }
 0x122   :  { %2812 = vmatprep.subr.mxu1 %v5077_v1 }
 0x123   :  { %2813 = vmatpush3.msra.mxu1 %v3887_v38 }
 0x124   :  { %2814 = vmatprep.subr.mxu1 %v5077_v1 }
 0x125   :  { %2815 = vmatpush3.msra.mxu1 %v3899_v42 }
 0x126   :  { %2816 = vmatprep.subr.mxu1 %v5077_v1 }
 0x127   :  { %2817 = vmatpush3.msra.mxu1 %v3908_v45 }
 0x128   :  { %2818 = vmatprep.subr.mxu1 %v5077_v1 }
 0x129   :  { %2819 = vmatpush3.msra.mxu1 %v3919_v48 }
 0x12a   :  { %2820 = vmatprep.subr.mxu1 %v5077_v1 }
 0x12b   :  { %2821 = vmatpush3.msra.mxu1 %v3933_v50 }
 0x12c   :  { %2822 = vmatprep.subr.mxu1 %v5077_v1 }
 0x12d   :  { %2823 = vmatpush3.msra.mxu1 %v3940_v52 }
 0x12e   :  { %2824 = vmatprep.subr.mxu1 %v5077_v1 }
 0x12f   :  { %2825 = vmatpush3.msra.mxu1 %v3948_v54 }
 0x130   :  { %2826 = vmatprep.subr.mxu1 %v5077_v1 }
 0x131   :  { %2827 = vmatpush3.msra.mxu1 %v3962_v58 }
 0x132   :  { %2828 = vmatprep.subr.mxu1 %v5077_v1 }
 0x133   :  { %2829 = vmatpush3.msra.mxu1 %v3968_v60 }
 0x134   :  { %2830 = vmatprep.subr.mxu1 %v5077_v1 }
 0x135   :  { %2831 = vmatpush3.msra.mxu1 %v3993_v8 }
 0x136   :  { %2832 = vmatprep.subr.mxu1 %v5077_v1 }
 0x137   :  { %2833 = vmatpush3.msra.mxu1 %v4004_v23 }
 0x138   :  { %2834 = vmatprep.subr.mxu1 %v5077_v1 }
 0x139   :  { %2835 = vmatpush3.msra.mxu1 %v4023_v29 }
 0x13a   :  { %2836 = vmatprep.subr.mxu1 %v5077_v1 }
 0x13b   :  { %2837 = vmatpush3.msra.mxu1 %v4031_v31 }
 0x13c   :  { %2838 = vmatprep.subr.mxu1 %v5077_v1 }
 0x13d   :  { %2839 = vmatpush3.msra.mxu1 %v4039_v40 }
 0x13e   :  { %2878 = vmatprep.subr.mxu1 %v5077_v1 }
 0x18f   :  { %v3980_v63 = vpop.permute.xlu0 %327 }
 0x190   :  { %v329_v7 = vmul.f32 %v3980_v63, %v3911_v46 }
 0x192   :  { %v3998_v21 = vmul.f32 %v329_v7, %v3978_v62 }
 0x194   :  { %331 = vrot.lane.b32.xlu0 %v3998_v21, %s3708_s20 }
 0x1dd   :  { %v506_v46 = vpop.f32.mrf.mxu1 }
 0x206   :  { %v332_v55 = vpop.permute.xlu0 %331 }
 0x207   :  { %v333_v57 = vadd.f32 %v332_v55, %v3998_v21  ;;  %v4162_v21 = vpop.f32.mrf.mxu0 }
 0x208   :  { %5124 = vst [vmem:[#allocation20_spill] sm:$0xff] %v4162_v21 }
 0x209   :  { %v4090_v6 = vadd.f32 %v334_v61, %v333_v57  ;;  %v4164_v28 = vpop.f32.mrf.mxu0 }
 0x20a   :  { %5125 = vst [vmem:[#allocation21_spill] sm:$0xff] %v4164_v28 }
 0x20b   :  { %3520 = vtanh.f32 %v4090_v6  ;;  %v4166_v55 = vpop.f32.mrf.mxu0 }
 0x20c   :  { %5126 = vst [vmem:[#allocation22_spill] sm:$0xff] %v4166_v55 }
 0x20d   :  { %v4168_v57 = vpop.f32.mrf.mxu0 }
 0x20e   :  { %5127 = vst [vmem:[#allocation23_spill] sm:$0xff] %v4168_v57 }
 0x20f   :  { %v4170_v61 = vpop.f32.mrf.mxu0 }
 0x210   :  { %5128 = vst [vmem:[#allocation24_spill] sm:$0xff] %v4170_v61  ;;  %v198_v61 = vadd.f32 %v3863_v25, %v3868_v26 }
 0x218   :  { %v3521_v7 = vpop.eup %3520 }
 0x219   :  { %v337_v24 = vmul.f32 %v3521_v7, %v3980_v63  ;;  %v2772_v63 = vpop.f32.mrf.mxu1  ;;  %v4172_v7 = vpop.f32.mrf.mxu0 }
 0x21a   :  { %5129 = vst [vmem:[#allocation25_spill] sm:$0xff] %v4172_v7 }
 0x21b   :  { %2736 = vmatmul.mubr.f32.vlgmr.msra.gmra.mxu0 %v337_v24 }
 0x21c   :  { %2774 = vmatpush3.msra.mxu0 %v3774_v2  ;;  %2805 = vmatprep.mubr.msk.f32.mxu0 %vm3705_vm0, %v5077_v1 }
 0x21d   :  { %2775 = vmatprep.subr.mxu0 %v5077_v1 }
 0x21e   :  { %2776 = vmatpush3.msra.mxu0 %v3776_v3 }
 0x21f   :  { %2777 = vmatprep.subr.mxu0 %v5077_v1 }
 0x220   :  { %2778 = vmatpush3.msra.mxu0 %v3780_v4 }
 0x221   :  { %2779 = vmatprep.subr.mxu0 %v5077_v1 }
 0x222   :  { %2780 = vmatpush3.msra.mxu0 %v3784_v5 }
 0x223   :  { %2781 = vmatprep.subr.mxu0 %v5077_v1 }
 0x224   :  { %2782 = vmatpush3.msra.mxu0 %v3797_v9 }
 0x225   :  { %2783 = vmatprep.subr.mxu0 %v5077_v1 }
 0x226   :  { %2784 = vmatpush3.msra.mxu0 %v3802_v10 }
 0x227   :  { %2785 = vmatprep.subr.mxu0 %v5077_v1 }
 0x228   :  { %2786 = vmatpush3.msra.mxu0 %v3808_v11 }
 0x229   :  { %2787 = vmatprep.subr.mxu0 %v5077_v1 }
 0x22a   :  { %2788 = vmatpush3.msra.mxu0 %v3812_v12 }
 0x22b   :  { %2789 = vmatprep.subr.mxu0 %v5077_v1 }
 0x22c   :  { %2790 = vmatpush3.msra.mxu0 %v3816_v13 }
 0x22d   :  { %2791 = vmatprep.subr.mxu0 %v5077_v1 }
 0x22e   :  { %2792 = vmatpush3.msra.mxu0 %v3820_v14 }
 0x22f   :  { %2793 = vmatprep.subr.mxu0 %v5077_v1 }
 0x230   :  { %2794 = vmatpush3.msra.mxu0 %v3824_v15 }
 0x231   :  { %2795 = vmatprep.subr.mxu0 %v5077_v1 }
 0x232   :  { %2796 = vmatpush3.msra.mxu0 %v3828_v16 }
 0x233   :  { %2797 = vmatprep.subr.mxu0 %v5077_v1 }
 0x234   :  { %2798 = vmatpush3.msra.mxu0 %v3832_v17 }
 0x235   :  { %2799 = vmatprep.subr.mxu0 %v5077_v1 }
 0x236   :  { %2800 = vmatpush3.msra.mxu0 %v3836_v18 }
 0x237   :  { %2801 = vmatprep.subr.mxu0 %v5077_v1 }
 0x238   :  { %2802 = vmatpush3.msra.mxu0 %v3840_v19 }
 0x239   :  { %2803 = vmatprep.subr.mxu0 %v5077_v1 }
 0x23a   :  { %2804 = vmatpush3.msra.mxu0 %v3844_v20 }
 0x23b   :  { %2806 = vmatmul.mubr.f32.vlgmr.msra.gmra.mxu0 %v337_v24  ;;  %2843 = vmatprep.subr.mxu0 %v5077_v1 }
 0x23c   :  { %2844 = vmatpush3.msra.mxu0 %v3873_v33  ;;  %2875 = vmatprep.mubr.msk.f32.mxu0 %vm3705_vm0, %v5077_v1 }
 0x23d   :  { %2845 = vmatprep.subr.mxu0 %v5077_v1 }
 0x23e   :  { %2846 = vmatpush3.msra.mxu0 %v3879_v35 }
 0x23f   :  { %2847 = vmatprep.subr.mxu0 %v5077_v1 }
 0x240   :  { %2848 = vmatpush3.msra.mxu0 %v3889_v39 }
 0x241   :  { %2849 = vmatprep.subr.mxu0 %v5077_v1 }
 0x242   :  { %2850 = vmatpush3.msra.mxu0 %v3901_v43 }
 0x243   :  { %2851 = vmatprep.subr.mxu0 %v5077_v1 }
 0x244   :  { %2852 = vmatpush3.msra.mxu0 %v3915_v47 }
 0x245   :  { %2853 = vmatprep.subr.mxu0 %v5077_v1 }
 0x246   :  { %2854 = vmatpush3.msra.mxu0 %v3924_v49 }
 0x247   :  { %2855 = vmatprep.subr.mxu0 %v5077_v1 }
 0x248   :  { %2856 = vmatpush3.msra.mxu0 %v3936_v51 }
 0x249   :  { %2857 = vmatprep.subr.mxu0 %v5077_v1 }
 0x24a   :  { %2858 = vmatpush3.msra.mxu0 %v3944_v53 }
 0x24b   :  { %2859 = vmatprep.subr.mxu0 %v5077_v1 }
 0x24c   :  { %2860 = vmatpush3.msra.mxu0 %v3955_v56 }
 0x24d   :  { %2861 = vmatprep.subr.mxu0 %v5077_v1 }
 0x24e   :  { %2862 = vmatpush3.msra.mxu0 %v3964_v59 }
 0x24f   :  { %2863 = vmatprep.subr.mxu0 %v5077_v1 }
 0x250   :  { %2864 = vmatpush3.msra.mxu0 %v3984_v0 }
 0x251   :  { %2865 = vmatprep.subr.mxu0 %v5077_v1 }
 0x252   :  { %2866 = vmatpush3.msra.mxu0 %v4002_v22 }
 0x253   :  { %2867 = vmatprep.subr.mxu0 %v5077_v1 }
 0x254   :  { %2868 = vmatpush3.msra.mxu0 %v4014_v27 }
 0x255   :  { %2869 = vmatprep.subr.mxu0 %v5077_v1 }
 0x256   :  { %2870 = vmatpush3.msra.mxu0 %v4025_v30 }
 0x257   :  { %2871 = vmatprep.subr.mxu0 %v5077_v1 }
 0x258   :  { %2872 = vmatpush3.msra.mxu0 %v4033_v36 }
 0x259   :  { %2873 = vmatprep.subr.mxu0 %v5077_v1 }
 0x25a   :  { %2874 = vmatpush3.msra.mxu0 %v4043_v44  ;;  %v4177_v44 = vld [vmem:[%s5071_s6] ss:$0 sm:$0xff] }
 0x25b   :  { %2913 = vmatprep.subr.mxu0 %v5077_v1 }
 0x2db   :  { %v436_v24 = vpop.f32.mrf.mxu0 }
 0x2dc   :  { %v507_v1 = vadd.f32 %v506_v46, %v436_v24 }
 0x2dd   :  { %v2737_v63 = vpop.f32.mrf.mxu0 }
 0x2de   :  { %v510_v21 = vadd.f32 %v4177_v44, %v507_v1 }
 0x2e0   :  { %3522 = vtanh.f32 %v510_v21 }
 0x2ed   :  { %v3523_v28 = vpop.eup %3522 }
 0x2ee   :  { %v512_v55 = vmul.f32 %v3523_v28, %v3883_v37 }
 0x2f0   :  { %v513_v57 = vadd.f32 %v512_v55, %v3895_v41 }
 0x2f2   :  { %514 = vrot.lane.b32.xlu0 %v513_v57, %s3707_s10 }
 0x2fb   :  { %v591_v7 = vpop.f32.mrf.mxu0 }
 0x2fc   :  { %v592_v36 = vadd.f32 %v591_v7, %v198_v61 }
 0x2fd   :  { %v2807_v30 = vpop.f32.mrf.mxu0 }
 0x2fe   :  { %3524 = vtanh.f32 %v592_v36 }
 0x30b   :  { %v3525_v27 = vpop.eup %3524 }
 0x30c   :  { %v596_v46 = vmul.f32 %v3525_v27, %v3883_v37 }
 0x30e   :  { %v597_v1 = vadd.f32 %v596_v46, %v3895_v41  ;;  %v521_v46 = vmul.f32 0.0, %v513_v57 }
 0x310   :  { %598 = vrot.lane.b32.xlu1 %v597_v1, %s3707_s10  ;;  %v605_v27 = vmul.f32 %v597_v1, %v4090_v6  ;;  %v5130_v6 = vmov 0.0  }
 0x364   :  { %v515_v21 = vpop.permute.xlu0 %514 }
 0x365   :  { %v516_v55 = vmul.f32 %v515_v21, %v513_v57  ;;  %v5133_v57 = vld [vmem:[#allocation18_spill] sm:$0xff] }
 0x367   :  { %v517_v25 = vmul.f32 %v516_v55, %v3978_v62 }
 0x382   :  { %v599_v28 = vpop.permute.xlu1 %598 }
 0x383   :  { %v600_v24 = vmul.f32 %v599_v28, %v597_v1 }
 0x385   :  { %v601_v63 = vmul.f32 %v600_v24, %v3978_v62 }
 0x387   :  { %602 = vrot.lane.b32.xlu1 %v601_v63, %s3708_s20 }
 0x38b   :  { %518 = vrot.lane.b32.xlu1 %v517_v25, %s3708_s20 }
 0x3f9   :  { %v603_v30 = vpop.permute.xlu1 %602 }
 0x3fa   :  { %v604_v36 = vadd.f32 %v603_v30, %v601_v63 }
 0x3fc   :  { %v4193_v61 = vadd.f32 %v605_v27, %v604_v36 }
 0x3fd   :  { %v519_v7 = vpop.permute.xlu1 %518 }
 0x3fe   :  { %3526 = vtanh.f32 %v4193_v61  ;;  %v520_v41 = vadd.f32 %v519_v7, %v517_v25  ;;  %v5135_v7 = vld [vmem:[#allocation21_spill] sm:$0xff] }
 0x400   :  { %v4196_v37 = vadd.f32 %v521_v46, %v520_v41  ;;  %v5132_v41 = vld [vmem:[#allocation17_spill] sm:$0xff]  ;;  %v5136_v46 = vld [vmem:[#allocation10_spill] sm:$0xff] }
 0x402   :  { %3528 = vtanh.f32 %v4196_v37 }
 0x40b   :  { %v3527_v24 = vpop.eup %3526 }
 0x40c   :  { %v4199_v26 = vmul.f32 %v3527_v24, %v599_v28  ;;  %v203_v24 = vadd.f32 %v5136_v46, %v5135_v7 }
 0x40e   :  { %2841 = vmatmul.mubr.f32.vlgmr.msra.gmra.mxu1 %v4199_v26 }
 0x40f   :  { %v3529_v55 = vpop.eup %3528  ;;  %2879 = vmatpush3.msra.mxu1 %v3774_v2  ;;  %2910 = vmatprep.mubr.msk.f32.mxu1 %vm3705_vm0, %v5130_v6 }
 0x410   :  { %2880 = vmatprep.subr.mxu1 %v5130_v6  ;;  %v524_v1 = vmul.f32 %v3529_v55, %v515_v21  ;;  %v5134_v21 = vld [vmem:[#allocation19_spill] sm:$0xff] }
 0x411   :  { %2881 = vmatpush3.msra.mxu1 %v3776_v3 }
 0x412   :  { %2882 = vmatprep.subr.mxu1 %v5130_v6  ;;  %2876 = vmatmul.mubr.f32.vlgmr.msra.gmra.mxu0 %v524_v1 }
 0x413   :  { %2883 = vmatpush3.msra.mxu1 %v3780_v4  ;;  %2914 = vmatpush3.msra.mxu0 %v3871_v32 }
 0x414   :  { %2884 = vmatprep.subr.mxu1 %v5130_v6  ;;  %2915 = vmatprep.subr.mxu0 %v5130_v6 }
 0x415   :  { %2885 = vmatpush3.msra.mxu1 %v3784_v5  ;;  %2916 = vmatpush3.msra.mxu0 %v3875_v34 }
 0x416   :  { %2886 = vmatprep.subr.mxu1 %v5130_v6  ;;  %2917 = vmatprep.subr.mxu0 %v5130_v6 }
 0x417   :  { %2887 = vmatpush3.msra.mxu1 %v3797_v9  ;;  %2918 = vmatpush3.msra.mxu0 %v3887_v38 }
 0x418   :  { %2888 = vmatprep.subr.mxu1 %v5130_v6  ;;  %2919 = vmatprep.subr.mxu0 %v5130_v6 }
 0x419   :  { %2889 = vmatpush3.msra.mxu1 %v3802_v10  ;;  %2920 = vmatpush3.msra.mxu0 %v3899_v42 }
 0x41a   :  { %2890 = vmatprep.subr.mxu1 %v5130_v6  ;;  %2921 = vmatprep.subr.mxu0 %v5130_v6 }
 0x41b   :  { %2891 = vmatpush3.msra.mxu1 %v3808_v11  ;;  %2922 = vmatpush3.msra.mxu0 %v3908_v45 }
 0x41c   :  { %2892 = vmatprep.subr.mxu1 %v5130_v6  ;;  %2923 = vmatprep.subr.mxu0 %v5130_v6 }
 0x41d   :  { %2893 = vmatpush3.msra.mxu1 %v3812_v12  ;;  %2924 = vmatpush3.msra.mxu0 %v3919_v48 }
 0x41e   :  { %2894 = vmatprep.subr.mxu1 %v5130_v6  ;;  %2925 = vmatprep.subr.mxu0 %v5130_v6 }
 0x41f   :  { %2895 = vmatpush3.msra.mxu1 %v3816_v13  ;;  %2926 = vmatpush3.msra.mxu0 %v3933_v50 }
 0x420   :  { %2896 = vmatprep.subr.mxu1 %v5130_v6  ;;  %2927 = vmatprep.subr.mxu0 %v5130_v6 }
 0x421   :  { %2897 = vmatpush3.msra.mxu1 %v3820_v14  ;;  %2928 = vmatpush3.msra.mxu0 %v3940_v52 }
 0x422   :  { %2898 = vmatprep.subr.mxu1 %v5130_v6  ;;  %2929 = vmatprep.subr.mxu0 %v5130_v6 }
 0x423   :  { %2899 = vmatpush3.msra.mxu1 %v3824_v15  ;;  %2930 = vmatpush3.msra.mxu0 %v3948_v54 }
 0x424   :  { %2900 = vmatprep.subr.mxu1 %v5130_v6  ;;  %2931 = vmatprep.subr.mxu0 %v5130_v6 }
 0x425   :  { %2901 = vmatpush3.msra.mxu1 %v3828_v16  ;;  %2932 = vmatpush3.msra.mxu0 %v3962_v58 }
 0x426   :  { %2902 = vmatprep.subr.mxu1 %v5130_v6  ;;  %2933 = vmatprep.subr.mxu0 %v5130_v6 }
 0x427   :  { %2903 = vmatpush3.msra.mxu1 %v3832_v17  ;;  %2934 = vmatpush3.msra.mxu0 %v3968_v60 }
 0x428   :  { %2904 = vmatprep.subr.mxu1 %v5130_v6  ;;  %2935 = vmatprep.subr.mxu0 %v5130_v6 }
 0x429   :  { %2905 = vmatpush3.msra.mxu1 %v3836_v18  ;;  %2936 = vmatpush3.msra.mxu0 %v3993_v8 }
 0x42a   :  { %2906 = vmatprep.subr.mxu1 %v5130_v6  ;;  %2937 = vmatprep.subr.mxu0 %v5130_v6 }
 0x42b   :  { %2907 = vmatpush3.msra.mxu1 %v3840_v19  ;;  %2938 = vmatpush3.msra.mxu0 %v4004_v23 }
 0x42c   :  { %2908 = vmatprep.subr.mxu1 %v5130_v6  ;;  %2939 = vmatprep.subr.mxu0 %v5130_v6 }
 0x42d   :  { %2909 = vmatpush3.msra.mxu1 %v3844_v20  ;;  %2940 = vmatpush3.msra.mxu0 %v4023_v29 }
 0x42e   :  { %2911 = vmatmul.mubr.f32.vlgmr.msra.gmra.mxu1 %v4199_v26  ;;  %2948 = vmatprep.subr.mxu1 %v5130_v6  ;;  %v5131_v26 = vld [vmem:[#allocation16_spill] sm:$0xff] }
 0x42f   :  { %2949 = vmatpush3.msra.mxu1 %v3873_v33  ;;  %2941 = vmatprep.subr.mxu0 %v5130_v6 }
 0x430   :  { %2950 = vmatprep.subr.mxu1 %v5130_v6  ;;  %2942 = vmatpush3.msra.mxu0 %v4031_v31 }
 0x431   :  { %2951 = vmatpush3.msra.mxu1 %v3879_v35  ;;  %2943 = vmatprep.subr.mxu0 %v5130_v6 }
 0x432   :  { %2952 = vmatprep.subr.mxu1 %v5130_v6  ;;  %2944 = vmatpush3.msra.mxu0 %v4039_v40 }
 0x433   :  { %2953 = vmatpush3.msra.mxu1 %v3889_v39  ;;  %2945 = vmatprep.mubr.msk.f32.mxu0 %vm3705_vm0, %v5130_v6 }
 0x434   :  { %2954 = vmatprep.subr.mxu1 %v5130_v6  ;;  %2983 = vmatprep.subr.mxu0 %v5130_v6 }
 0x435   :  { %2955 = vmatpush3.msra.mxu1 %v3901_v43  ;;  %2980 = vmatprep.mubr.msk.f32.mxu1 %vm3705_vm0, %v5130_v6 }
 0x436   :  { %2956 = vmatprep.subr.mxu1 %v5130_v6 }
 0x437   :  { %2957 = vmatpush3.msra.mxu1 %v3915_v47 }
 0x438   :  { %2958 = vmatprep.subr.mxu1 %v5130_v6 }
 0x439   :  { %2959 = vmatpush3.msra.mxu1 %v3924_v49 }
 0x43a   :  { %2960 = vmatprep.subr.mxu1 %v5130_v6 }
 0x43b   :  { %2961 = vmatpush3.msra.mxu1 %v3936_v51 }
 0x43c   :  { %2962 = vmatprep.subr.mxu1 %v5130_v6 }
 0x43d   :  { %2963 = vmatpush3.msra.mxu1 %v3944_v53 }
 0x43e   :  { %2964 = vmatprep.subr.mxu1 %v5130_v6 }
 0x43f   :  { %2965 = vmatpush3.msra.mxu1 %v3955_v56 }
 0x440   :  { %2966 = vmatprep.subr.mxu1 %v5130_v6 }
 0x441   :  { %2967 = vmatpush3.msra.mxu1 %v3964_v59 }
 0x442   :  { %2968 = vmatprep.subr.mxu1 %v5130_v6 }
 0x443   :  { %2969 = vmatpush3.msra.mxu1 %v3984_v0  ;;  %v5138_v0 = vld [vmem:[#allocation12_spill] sm:$0xff] }
 0x444   :  { %2970 = vmatprep.subr.mxu1 %v5130_v6 }
 0x445   :  { %2971 = vmatpush3.msra.mxu1 %v4002_v22 }
 0x446   :  { %2972 = vmatprep.subr.mxu1 %v5130_v6 }
 0x447   :  { %2973 = vmatpush3.msra.mxu1 %v5131_v26 }
 0x448   :  { %2974 = vmatprep.subr.mxu1 %v5130_v6 }
 0x449   :  { %2975 = vmatpush3.msra.mxu1 %v5132_v41 }
 0x44a   :  { %2976 = vmatprep.subr.mxu1 %v5130_v6 }
 0x44b   :  { %2977 = vmatpush3.msra.mxu1 %v5133_v57 }
 0x44c   :  { %2978 = vmatprep.subr.mxu1 %v5130_v6 }
 0x44d   :  { %2979 = vmatpush3.msra.mxu1 %v5134_v21  ;;  %v5137_v21 = vld [vmem:[#allocation11_spill] sm:$0xff] }
 0x44e   :  { %3018 = vmatprep.subr.mxu1 %v5130_v6 }
 0x4ce   :  { %v675_v28 = vpop.f32.mrf.mxu1 }
 0x4d0   :  { %v2842_v63 = vpop.f32.mrf.mxu1 }
 0x4d2   :  { %v745_v25 = vpop.f32.mrf.mxu0 }
 0x4d3   :  { %v746_v36 = vadd.f32 %v745_v25, %v675_v28 }
 0x4d4   :  { %v2877_v30 = vpop.f32.mrf.mxu0 }
 0x4d5   :  { %v749_v27 = vadd.f32 %v4177_v44, %v746_v36 }
 0x4d7   :  { %3530 = vtanh.f32 %v749_v27 }
 0x4e4   :  { %v3531_v41 = vpop.eup %3530 }
 0x4e5   :  { %v751_v63 = vmul.f32 %v3531_v41, %v5137_v21 }
 0x4e7   :  { %v752_v28 = vadd.f32 %v751_v63, %v5138_v0 }
 0x4ee   :  { %v830_v55 = vpop.f32.mrf.mxu1 }
 0x4ef   :  { %v831_v1 = vadd.f32 %v830_v55, %v203_v24 }
 0x4f0   :  { %v2912_v57 = vpop.f32.mrf.mxu1 }
 0x4f1   :  { %3532 = vtanh.f32 %v831_v1  ;;  %v760_v1 = vmul.f32 %v752_v28, %v4196_v37 }
 0x4fe   :  { %v3533_v26 = vpop.eup %3532 }
 0x4ff   :  { %v835_v22 = vmul.f32 %v3533_v26, %v5137_v21 }
 0x501   :  { %v836_v59 = vadd.f32 %v835_v22, %v5138_v0 }
 0x503   :  { %837 = vrot.lane.b32.xlu0 %v836_v59, %s3707_s10  ;;  %v844_v7 = vmul.f32 %v836_v59, %v4193_v61  ;;  %v4461_v61 = vld [vmem:[#allocation3 + $0x78] sm:$0xff] }
 0x507   :  { %753 = vrot.lane.b32.xlu0 %v752_v28, %s3707_s10 }
 0x575   :  { %v838_v25 = vpop.permute.xlu0 %837 }
 0x576   :  { %v839_v30 = vmul.f32 %v838_v25, %v836_v59 }
 0x578   :  { %v840_v36 = vmul.f32 %v839_v30, %v3978_v62 }
 0x579   :  { %v754_v57 = vpop.permute.xlu0 %753 }
 0x57a   :  { %v755_v27 = vmul.f32 %v754_v57, %v752_v28  ;;  %841 = vrot.lane.b32.xlu1 %v840_v36, %s3708_s20 }
 0x57c   :  { %v756_v26 = vmul.f32 %v755_v27, %v3978_v62 }
 0x57e   :  { %757 = vrot.lane.b32.xlu1 %v756_v26, %s3708_s20 }
 0x5ec   :  { %v842_v22 = vpop.permute.xlu1 %841 }
 0x5ed   :  { %v843_v41 = vadd.f32 %v842_v22, %v840_v36  ;;  %v4479_v22 = vld [vmem:[#allocation3 + $0x60] sm:$0xff] }
 0x5ef   :  { %v4319_v46 = vadd.f32 %v844_v7, %v843_v41  ;;  %v4482_v41 = vld [vmem:[#allocation5 + $0x70] sm:$0xff]  ;;  %v4487_v7 = vld [vmem:[#allocation3 + $0x58] sm:$0xff] }
 0x5f0   :  { %v758_v24 = vpop.permute.xlu1 %757 }
 0x5f1   :  { %3534 = vtanh.f32 %v4319_v46  ;;  %v759_v55 = vadd.f32 %v758_v24, %v756_v26  ;;  %v4474_v26 = vld [vmem:[#allocation5 + $0x78] sm:$0xff]  ;;  %v4495_v24 = vld [vmem:[#allocation3 + $0x50] sm:$0xff] }
 0x5f3   :  { %v4323_v63 = vadd.f32 %v760_v1, %v759_v55  ;;  %v4498_v55 = vld [vmem:[#allocation5 + $0x60] sm:$0xff]  ;;  %v4503_v1 = vld [vmem:[#allocation3 + $0x48] sm:$0xff] }
 0x5f5   :  { %3536 = vtanh.f32 %v4323_v63 }
 0x5fe   :  { %v3535_v30 = vpop.eup %3534 }
 0x5ff   :  { %v4326_v27 = vmul.f32 %v3535_v30, %v838_v25  ;;  %v4467_v25 = vld [vmem:[#allocation3 + $0x70] sm:$0xff]  ;;  %v4511_v30 = vld [vmem:[#allocation3 + $0x40] sm:$0xff] }
 0x601   :  { %2946 = vmatmul.mubr.f32.vlgmr.msra.gmra.mxu0 %v4326_v27 }
 0x602   :  { %v3537_v36 = vpop.eup %3536  ;;  %2984 = vmatpush3.msra.mxu0 %v3774_v2  ;;  %3015 = vmatprep.mubr.msk.f32.mxu0 %vm3705_vm0, %v5130_v6  ;;  %v5139_v2 = vld [vmem:[#allocation13_spill] sm:$0xff] }
 0x603   :  { %2985 = vmatprep.subr.mxu0 %v5130_v6  ;;  %v763_v59 = vmul.f32 %v3537_v36, %v754_v57  ;;  %v4471_v57 = vld [vmem:[#allocation3 + $0x68] sm:$0xff]  ;;  %v4519_v36 = vld [vmem:[#allocation3 + $0x38] sm:$0xff] }
 0x604   :  { %2986 = vmatpush3.msra.mxu0 %v3776_v3  ;;  %v5140_v3 = vld [vmem:[#allocation14_spill] sm:$0xff] }
 0x605   :  { %2987 = vmatprep.subr.mxu0 %v5130_v6  ;;  %2981 = vmatmul.mubr.f32.vlgmr.msra.gmra.mxu1 %v763_v59  ;;  %v4522_v59 = vld [vmem:[#allocation5 + $0x48] sm:$0xff] }
 0x606   :  { %2988 = vmatpush3.msra.mxu0 %v3780_v4  ;;  %3019 = vmatpush3.msra.mxu1 %v3871_v32  ;;  %v5141_v4 = vld [vmem:[#allocation15_spill] sm:$0xff] }
 0x607   :  { %2989 = vmatprep.subr.mxu0 %v5130_v6  ;;  %3020 = vmatprep.subr.mxu1 %v5130_v6 }
 0x608   :  { %2990 = vmatpush3.msra.mxu0 %v3784_v5  ;;  %3021 = vmatpush3.msra.mxu1 %v3875_v34  ;;  %v5142_v5 = vld [vmem:[#allocation16_spill] sm:$0xff] }
 0x609   :  { %2991 = vmatprep.subr.mxu0 %v5130_v6  ;;  %3022 = vmatprep.subr.mxu1 %v5130_v6 }
 0x60a   :  { %2992 = vmatpush3.msra.mxu0 %v3797_v9  ;;  %3023 = vmatpush3.msra.mxu1 %v3887_v38  ;;  %v5143_v9 = vld [vmem:[#allocation17_spill] sm:$0xff] }
 0x60b   :  { %2993 = vmatprep.subr.mxu0 %v5130_v6  ;;  %3024 = vmatprep.subr.mxu1 %v5130_v6 }
 0x60c   :  { %2994 = vmatpush3.msra.mxu0 %v3802_v10  ;;  %3025 = vmatpush3.msra.mxu1 %v3899_v42  ;;  %v5144_v10 = vld [vmem:[#allocation18_spill] sm:$0xff] }
 0x60d   :  { %2995 = vmatprep.subr.mxu0 %v5130_v6  ;;  %3026 = vmatprep.subr.mxu1 %v5130_v6 }
 0x60e   :  { %2996 = vmatpush3.msra.mxu0 %v3808_v11  ;;  %3027 = vmatpush3.msra.mxu1 %v3908_v45  ;;  %v5145_v11 = vld [vmem:[#allocation19_spill] sm:$0xff] }
 0x60f   :  { %2997 = vmatprep.subr.mxu0 %v5130_v6  ;;  %3028 = vmatprep.subr.mxu1 %v5130_v6 }
 0x610   :  { %2998 = vmatpush3.msra.mxu0 %v3812_v12  ;;  %3029 = vmatpush3.msra.mxu1 %v3919_v48 }
 0x611   :  { %2999 = vmatprep.subr.mxu0 %v5130_v6  ;;  %3030 = vmatprep.subr.mxu1 %v5130_v6 }
 0x612   :  { %3000 = vmatpush3.msra.mxu0 %v3816_v13  ;;  %3031 = vmatpush3.msra.mxu1 %v3933_v50 }
 0x613   :  { %3001 = vmatprep.subr.mxu0 %v5130_v6  ;;  %3032 = vmatprep.subr.mxu1 %v5130_v6 }
 0x614   :  { %3002 = vmatpush3.msra.mxu0 %v3820_v14  ;;  %3033 = vmatpush3.msra.mxu1 %v3940_v52 }
 0x615   :  { %3003 = vmatprep.subr.mxu0 %v5130_v6  ;;  %3034 = vmatprep.subr.mxu1 %v5130_v6 }
 0x616   :  { %3004 = vmatpush3.msra.mxu0 %v3824_v15  ;;  %3035 = vmatpush3.msra.mxu1 %v3948_v54 }
 0x617   :  { %3005 = vmatprep.subr.mxu0 %v5130_v6  ;;  %3036 = vmatprep.subr.mxu1 %v5130_v6 }
 0x618   :  { %3006 = vmatpush3.msra.mxu0 %v3828_v16  ;;  %3037 = vmatpush3.msra.mxu1 %v3962_v58 }
 0x619   :  { %3007 = vmatprep.subr.mxu0 %v5130_v6  ;;  %3038 = vmatprep.subr.mxu1 %v5130_v6 }
 0x61a   :  { %3008 = vmatpush3.msra.mxu0 %v3832_v17  ;;  %3039 = vmatpush3.msra.mxu1 %v3968_v60 }
 0x61b   :  { %3009 = vmatprep.subr.mxu0 %v5130_v6  ;;  %3040 = vmatprep.subr.mxu1 %v5130_v6 }
 0x61c   :  { %3010 = vmatpush3.msra.mxu0 %v3836_v18  ;;  %3041 = vmatpush3.msra.mxu1 %v3993_v8  ;;  %v4436_v18 = vld [vmem:[%s5068_s3] ss:$0 sm:$0xff] }
 0x61d   :  { %3011 = vmatprep.subr.mxu0 %v5130_v6  ;;  %3042 = vmatprep.subr.mxu1 %v5130_v6 }
 0x61e   :  { %3012 = vmatpush3.msra.mxu0 %v3840_v19  ;;  %3043 = vmatpush3.msra.mxu1 %v4004_v23  ;;  %v5146_v19 = vld [vmem:[#allocation20_spill] sm:$0xff] }
 0x61f   :  { %3013 = vmatprep.subr.mxu0 %v5130_v6  ;;  %3044 = vmatprep.subr.mxu1 %v5130_v6 }
 0x620   :  { %3014 = vmatpush3.msra.mxu0 %v3844_v20  ;;  %3045 = vmatpush3.msra.mxu1 %v4023_v29  ;;  %v208_v20 = vadd.f32 %v4436_v18, %v5146_v19  ;;  %v4578_v19 = vld [vmem:[#allocation5 + $0x10] sm:$0xff] }
 0x621   :  { %3016 = vmatmul.mubr.f32.vlgmr.msra.gmra.mxu0 %v4326_v27  ;;  %3053 = vmatprep.subr.mxu0 %v5130_v6  ;;  %v4514_v27 = vld [vmem:[#allocation5 + $0x50] sm:$0xff] }
 0x622   :  { %3054 = vmatpush3.msra.mxu0 %v3873_v33  ;;  %3046 = vmatprep.subr.mxu1 %v5130_v6 }
 0x623   :  { %3055 = vmatprep.subr.mxu0 %v5130_v6  ;;  %3047 = vmatpush3.msra.mxu1 %v4031_v31 }
 0x624   :  { %3056 = vmatpush3.msra.mxu0 %v3879_v35  ;;  %3048 = vmatprep.subr.mxu1 %v5130_v6 }
 0x625   :  { %3057 = vmatprep.subr.mxu0 %v5130_v6  ;;  %3049 = vmatpush3.msra.mxu1 %v4039_v40 }
 0x626   :  { %3058 = vmatpush3.msra.mxu0 %v3889_v39  ;;  %3050 = vmatprep.mubr.msk.f32.mxu1 %vm3705_vm0, %v5130_v6 }
 0x627   :  { %3059 = vmatprep.subr.mxu0 %v5130_v6  ;;  %3088 = vmatprep.subr.mxu1 %v5130_v6 }
 0x628   :  { %3060 = vmatpush3.msra.mxu0 %v3901_v43  ;;  %3085 = vmatprep.mubr.msk.f32.mxu0 %vm3705_vm0, %v5130_v6 }
 0x629   :  { %3061 = vmatprep.subr.mxu0 %v5130_v6 }
 0x62a   :  { %3062 = vmatpush3.msra.mxu0 %v3915_v47 }
 0x62b   :  { %3063 = vmatprep.subr.mxu0 %v5130_v6 }
 0x62c   :  { %3064 = vmatpush3.msra.mxu0 %v3924_v49 }
 0x62d   :  { %3065 = vmatprep.subr.mxu0 %v5130_v6 }
 0x62e   :  { %3066 = vmatpush3.msra.mxu0 %v3936_v51 }
 0x62f   :  { %3067 = vmatprep.subr.mxu0 %v5130_v6 }
 0x630   :  { %3068 = vmatpush3.msra.mxu0 %v3944_v53 }
 0x631   :  { %3069 = vmatprep.subr.mxu0 %v5130_v6 }
 0x632   :  { %3070 = vmatpush3.msra.mxu0 %v3955_v56 }
 0x633   :  { %3071 = vmatprep.subr.mxu0 %v5130_v6 }
 0x634   :  { %3072 = vmatpush3.msra.mxu0 %v5139_v2  ;;  %v4527_v2 = vld [vmem:[#allocation3 + $0x30] sm:$0xff] }
 0x635   :  { %3073 = vmatprep.subr.mxu0 %v5130_v6 }
 0x636   :  { %3074 = vmatpush3.msra.mxu0 %v5140_v3  ;;  %v4530_v3 = vld [vmem:[#allocation5 + $0x40] sm:$0xff] }
 0x637   :  { %3075 = vmatprep.subr.mxu0 %v5130_v6 }
 0x638   :  { %3076 = vmatpush3.msra.mxu0 %v5141_v4  ;;  %v4535_v4 = vld [vmem:[#allocation3 + $0x28] sm:$0xff] }
 0x639   :  { %3077 = vmatprep.subr.mxu0 %v5130_v6 }
 0x63a   :  { %3078 = vmatpush3.msra.mxu0 %v5142_v5  ;;  %v4538_v5 = vld [vmem:[#allocation5 + $0x38] sm:$0xff] }
 0x63b   :  { %3079 = vmatprep.subr.mxu0 %v5130_v6 }
 0x63c   :  { %3080 = vmatpush3.msra.mxu0 %v5143_v9  ;;  %v4543_v9 = vld [vmem:[#allocation3 + $0x20] sm:$0xff] }
 0x63d   :  { %3081 = vmatprep.subr.mxu0 %v5130_v6 }
 0x63e   :  { %3082 = vmatpush3.msra.mxu0 %v5144_v10  ;;  %v4546_v10 = vld [vmem:[#allocation5 + $0x30] sm:$0xff] }
 0x63f   :  { %3083 = vmatprep.subr.mxu0 %v5130_v6 }
 0x640   :  { %3084 = vmatpush3.msra.mxu0 %v5145_v11  ;;  %v4551_v11 = vld [vmem:[#allocation3 + $0x18] sm:$0xff] }
 0x641   :  { %3123 = vmatprep.subr.mxu0 %v5130_v6 }
 0x6c1   :  { %v914_v12 = vpop.f32.mrf.mxu0 }
 0x6c3   :  { %v2947_v13 = vpop.f32.mrf.mxu0 }
 0x6c4   :  { %v4559_v13 = vld [vmem:[#allocation3 + $0x10] sm:$0xff] }
 0x6c5   :  { %v984_v14 = vpop.f32.mrf.mxu1 }
 0x6c6   :  { %v985_v16 = vadd.f32 %v984_v14, %v914_v12  ;;  %v4554_v12 = vld [vmem:[#allocation5 + $0x28] sm:$0xff]  ;;  %v4562_v14 = vld [vmem:[#allocation5 + $0x20] sm:$0xff] }
 0x6c7   :  { %v2982_v15 = vpop.f32.mrf.mxu1 }
 0x6c8   :  { %v988_v17 = vadd.f32 %v4177_v44, %v985_v16  ;;  %v4567_v15 = vld [vmem:[#allocation3 + $0x8] sm:$0xff]  ;;  %v4570_v16 = vld [vmem:[#allocation5 + $0x18] sm:$0xff] }
 0x6ca   :  { %3538 = vtanh.f32 %v988_v17  ;;  %v4575_v17 = vld [vmem:[#allocation3] sm:$0xff] }
 0x6d7   :  { %v3539_v35 = vpop.eup %3538 }
 0x6d8   :  { %v990_v42 = vmul.f32 %v3539_v35, %v5137_v21  ;;  %v4599_v35 = vld [vmem:[#allocation7 + $0x68] sm:$0xff] }
 0x6da   :  { %v991_v43 = vadd.f32 %v990_v42, %v5138_v0  ;;  %v4620_v42 = vld [vmem:[#allocation7 + $0x48] sm:$0xff] }
 0x6dc   :  { %v999_v60 = vmul.f32 %v991_v43, %v4323_v63  ;;  %v4506_v63 = vld [vmem:[#allocation5 + $0x58] sm:$0xff] }
 0x6e1   :  { %v1069_v32 = vpop.f32.mrf.mxu0 }
 0x6e2   :  { %v1070_v33 = vadd.f32 %v1069_v32, %v208_v20  ;;  %v4583_v20 = vld [vmem:[#allocation7 + $0x78] sm:$0xff]  ;;  %v4588_v32 = vld [vmem:[#allocation5 + $0x8] sm:$0xff] }
 0x6e3   :  { %v3017_v34 = vpop.f32.mrf.mxu0 }
 0x6e4   :  { %3540 = vtanh.f32 %v1070_v33  ;;  %v4591_v33 = vld [vmem:[#allocation7 + $0x70] sm:$0xff]  ;;  %v4596_v34 = vld [vmem:[#allocation5] sm:$0xff] }
 0x6f1   :  { %v3541_v37 = vpop.eup %3540 }
 0x6f2   :  { %v1074_v38 = vmul.f32 %v3541_v37, %v5137_v21  ;;  %v4606_v37 = vld [vmem:[#allocation7 + $0x60] sm:$0xff] }
 0x6f4   :  { %v1075_v39 = vadd.f32 %v1074_v38, %v5138_v0  ;;  %v4612_v38 = vld [vmem:[#allocation7 + $0x58] sm:$0xff] }
 0x6f6   :  { %1076 = vrot.lane.b32.xlu0 %v1075_v39, %s3707_s10  ;;  %v1083_v54 = vmul.f32 %v1075_v39, %v4319_v46  ;;  %v4490_v46 = vld [vmem:[#allocation5 + $0x68] sm:$0xff] }
 0x6fa   :  { %992 = vrot.lane.b32.xlu0 %v991_v43, %s3707_s10 }
 0x768   :  { %v1077_v45 = vpop.permute.xlu0 %1076 }
 0x769   :  { %v1078_v47 = vmul.f32 %v1077_v45, %v1075_v39  ;;  %v4616_v39 = vld [vmem:[#allocation7 + $0x50] sm:$0xff] }
 0x76b   :  { %v1079_v48 = vmul.f32 %v1078_v47, %v3978_v62  ;;  %v4632_v47 = vld [vmem:[#allocation7 + $0x30] sm:$0xff] }
 0x76c   :  { %v993_v49 = vpop.permute.xlu0 %992  ;;  %5147 = vst [vmem:[#allocation21_spill] sm:$0xff] %v4632_v47 }
 0x76d   :  { %v994_v50 = vmul.f32 %v993_v49, %v991_v43  ;;  %1080 = vrot.lane.b32.xlu1 %v1079_v48, %s3708_s20  ;;  %v4624_v43 = vld [vmem:[#allocation7 + $0x40] sm:$0xff] }
 0x76f   :  { %v995_v51 = vmul.f32 %v994_v50, %v3978_v62  ;;  %v4644_v50 = vld [vmem:[#allocation7 + $0x18] sm:$0xff] }
 0x770   :  { %5150 = vst [vmem:[#allocation12_spill] sm:$0xff] %v4644_v50 }
 0x771   :  { %996 = vrot.lane.b32.xlu1 %v995_v51, %s3708_s20 }
 0x7df   :  { %v1081_v52 = vpop.permute.xlu1 %1080 }
 0x7e0   :  { %v1082_v53 = vadd.f32 %v1081_v52, %v1079_v48  ;;  %v4636_v48 = vld [vmem:[#allocation7 + $0x28] sm:$0xff] }
 0x7e1   :  { %5148 = vst [vmem:[#allocation10_spill] sm:$0xff] %v4636_v48  ;;  %v4652_v52 = vld [vmem:[#allocation7 + $0x8] sm:$0xff] }
 0x7e2   :  { %v4451_v56 = vadd.f32 %v1083_v54, %v1082_v53  ;;  %5152 = vst [vmem:[#allocation14_spill] sm:$0xff] %v4652_v52  ;;  %v4656_v53 = vld [vmem:[#allocation7] sm:$0xff] }
 0x7e3   :  { %v997_v58 = vpop.permute.xlu1 %996  ;;  %5153 = vst [vmem:[#allocation15_spill] sm:$0xff] %v4656_v53 }
 0x7e4   :  { %3542 = vtanh.f32 %v4451_v56  ;;  %v998_v8 = vadd.f32 %v997_v58, %v995_v51  ;;  %v4648_v51 = vld [vmem:[#allocation7 + $0x10] sm:$0xff] }
 0x7e5   :  { %5151 = vst [vmem:[#allocation13_spill] sm:$0xff] %v4648_v51 }
 0x7e6   :  { %v4455_v23 = vadd.f32 %v999_v60, %v998_v8 }
 0x7e8   :  { %3544 = vtanh.f32 %v4455_v23 }
 0x7f1   :  { %v3543_v29 = vpop.eup %3542 }
 0x7f2   :  { %v4458_v31 = vmul.f32 %v3543_v29, %v1077_v45  ;;  %v4628_v45 = vld [vmem:[#allocation7 + $0x38] sm:$0xff] }
 0x7f4   :  { %3051 = vmatmul.mubr.f32.vlgmr.msra.gmra.mxu1 %v4458_v31 }
 0x7f5   :  { %v3545_v40 = vpop.eup %3544  ;;  %3089 = vmatpush3.msra.mxu1 %v4461_v61  ;;  %3120 = vmatprep.mubr.msk.f32.mxu1 %vm3705_vm0, %v5130_v6 }
 0x7f6   :  { %3090 = vmatprep.subr.mxu1 %v5130_v6  ;;  %v1002_v28 = vmul.f32 %v3545_v40, %v993_v49  ;;  %v4640_v49 = vld [vmem:[#allocation7 + $0x20] sm:$0xff]  ;;  %v5154_v40 = vld [vmem:[#allocation23_spill] sm:$0xff] }
 0x7f7   :  { %3091 = vmatpush3.msra.mxu1 %v4467_v25  ;;  %5149 = vst [vmem:[#allocation11_spill] sm:$0xff] %v4640_v49 }
 0x7f8   :  { %3092 = vmatprep.subr.mxu1 %v5130_v6  ;;  %3086 = vmatmul.mubr.f32.vlgmr.msra.gmra.mxu0 %v1002_v28  ;;  %v213_v28 = vadd.f32 %v4436_v18, %v5154_v40 }
 0x7f9   :  { %3093 = vmatpush3.msra.mxu1 %v4471_v57  ;;  %3124 = vmatpush3.msra.mxu0 %v4474_v26 }
 0x7fa   :  { %3094 = vmatprep.subr.mxu1 %v5130_v6  ;;  %3125 = vmatprep.subr.mxu0 %v5130_v6 }
 0x7fb   :  { %3095 = vmatpush3.msra.mxu1 %v4479_v22  ;;  %3126 = vmatpush3.msra.mxu0 %v4482_v41 }
 0x7fc   :  { %3096 = vmatprep.subr.mxu1 %v5130_v6  ;;  %3127 = vmatprep.subr.mxu0 %v5130_v6 }
 0x7fd   :  { %3097 = vmatpush3.msra.mxu1 %v4487_v7  ;;  %3128 = vmatpush3.msra.mxu0 %v4490_v46 }
 0x7fe   :  { %3098 = vmatprep.subr.mxu1 %v5130_v6  ;;  %3129 = vmatprep.subr.mxu0 %v5130_v6 }
 0x7ff   :  { %3099 = vmatpush3.msra.mxu1 %v4495_v24  ;;  %3130 = vmatpush3.msra.mxu0 %v4498_v55 }
 0x800   :  { %3100 = vmatprep.subr.mxu1 %v5130_v6  ;;  %3131 = vmatprep.subr.mxu0 %v5130_v6 }
 0x801   :  { %3101 = vmatpush3.msra.mxu1 %v4503_v1  ;;  %3132 = vmatpush3.msra.mxu0 %v4506_v63 }
 0x802   :  { %3102 = vmatprep.subr.mxu1 %v5130_v6  ;;  %3133 = vmatprep.subr.mxu0 %v5130_v6 }
 0x803   :  { %3103 = vmatpush3.msra.mxu1 %v4511_v30  ;;  %3134 = vmatpush3.msra.mxu0 %v4514_v27 }
 0x804   :  { %3104 = vmatprep.subr.mxu1 %v5130_v6  ;;  %3135 = vmatprep.subr.mxu0 %v5130_v6 }
 0x805   :  { %3105 = vmatpush3.msra.mxu1 %v4519_v36  ;;  %3136 = vmatpush3.msra.mxu0 %v4522_v59 }
 0x806   :  { %3106 = vmatprep.subr.mxu1 %v5130_v6  ;;  %3137 = vmatprep.subr.mxu0 %v5130_v6 }
 0x807   :  { %3107 = vmatpush3.msra.mxu1 %v4527_v2  ;;  %3138 = vmatpush3.msra.mxu0 %v4530_v3 }
 0x808   :  { %3108 = vmatprep.subr.mxu1 %v5130_v6  ;;  %3139 = vmatprep.subr.mxu0 %v5130_v6 }
 0x809   :  { %3109 = vmatpush3.msra.mxu1 %v4535_v4  ;;  %3140 = vmatpush3.msra.mxu0 %v4538_v5 }
 0x80a   :  { %3110 = vmatprep.subr.mxu1 %v5130_v6  ;;  %3141 = vmatprep.subr.mxu0 %v5130_v6 }
 0x80b   :  { %3111 = vmatpush3.msra.mxu1 %v4543_v9  ;;  %3142 = vmatpush3.msra.mxu0 %v4546_v10 }
 0x80c   :  { %3112 = vmatprep.subr.mxu1 %v5130_v6  ;;  %3143 = vmatprep.subr.mxu0 %v5130_v6 }
 0x80d   :  { %3113 = vmatpush3.msra.mxu1 %v4551_v11  ;;  %3144 = vmatpush3.msra.mxu0 %v4554_v12 }
 0x80e   :  { %3114 = vmatprep.subr.mxu1 %v5130_v6  ;;  %3145 = vmatprep.subr.mxu0 %v5130_v6 }
 0x80f   :  { %3115 = vmatpush3.msra.mxu1 %v4559_v13  ;;  %3146 = vmatpush3.msra.mxu0 %v4562_v14 }
 0x810   :  { %3116 = vmatprep.subr.mxu1 %v5130_v6  ;;  %3147 = vmatprep.subr.mxu0 %v5130_v6 }
 0x811   :  { %3117 = vmatpush3.msra.mxu1 %v4567_v15  ;;  %3148 = vmatpush3.msra.mxu0 %v4570_v16 }
 0x812   :  { %3118 = vmatprep.subr.mxu1 %v5130_v6  ;;  %3149 = vmatprep.subr.mxu0 %v5130_v6 }
 0x813   :  { %3119 = vmatpush3.msra.mxu1 %v4575_v17  ;;  %3150 = vmatpush3.msra.mxu0 %v4578_v19 }
 0x814   :  { %3121 = vmatmul.mubr.f32.vlgmr.msra.gmra.mxu1 %v4458_v31  ;;  %3158 = vmatprep.subr.mxu1 %v5130_v6 }
 0x815   :  { %3159 = vmatpush3.msra.mxu1 %v4583_v20  ;;  %3151 = vmatprep.subr.mxu0 %v5130_v6 }
 0x816   :  { %3160 = vmatprep.subr.mxu1 %v5130_v6  ;;  %3152 = vmatpush3.msra.mxu0 %v4588_v32 }
 0x817   :  { %3161 = vmatpush3.msra.mxu1 %v4591_v33  ;;  %3153 = vmatprep.subr.mxu0 %v5130_v6 }
 0x818   :  { %3162 = vmatprep.subr.mxu1 %v5130_v6  ;;  %3154 = vmatpush3.msra.mxu0 %v4596_v34 }
 0x819   :  { %3163 = vmatpush3.msra.mxu1 %v4599_v35  ;;  %3155 = vmatprep.mubr.msk.f32.mxu0 %vm3705_vm0, %v5130_v6 }
 0x81a   :  { %3164 = vmatprep.subr.mxu1 %v5130_v6  ;;  %3193 = vmatprep.subr.mxu0 %v5130_v6 }
 0x81b   :  { %3165 = vmatpush3.msra.mxu1 %v4606_v37  ;;  %3190 = vmatprep.mubr.msk.f32.mxu1 %vm3705_vm0, %v5130_v6 }
 0x81c   :  { %3166 = vmatprep.subr.mxu1 %v5130_v6 }
 0x81d   :  { %3167 = vmatpush3.msra.mxu1 %v4612_v38 }
 0x81e   :  { %3168 = vmatprep.subr.mxu1 %v5130_v6 }
 0x81f   :  { %3169 = vmatpush3.msra.mxu1 %v4616_v39 }
 0x820   :  { %3170 = vmatprep.subr.mxu1 %v5130_v6 }
 0x821   :  { %3171 = vmatpush3.msra.mxu1 %v4620_v42 }
 0x822   :  { %3172 = vmatprep.subr.mxu1 %v5130_v6 }
 0x823   :  { %3173 = vmatpush3.msra.mxu1 %v4624_v43 }
 0x824   :  { %3174 = vmatprep.subr.mxu1 %v5130_v6 }
 0x825   :  { %3175 = vmatpush3.msra.mxu1 %v4628_v45 }
 0x826   :  { %3176 = vmatprep.subr.mxu1 %v5130_v6 }
 0x827   :  { %3177 = vmatpush3.msra.mxu1 %v4632_v47 }
 0x828   :  { %3178 = vmatprep.subr.mxu1 %v5130_v6 }
 0x829   :  { %3179 = vmatpush3.msra.mxu1 %v4636_v48 }
 0x82a   :  { %3180 = vmatprep.subr.mxu1 %v5130_v6 }
 0x82b   :  { %3181 = vmatpush3.msra.mxu1 %v4640_v49 }
 0x82c   :  { %3182 = vmatprep.subr.mxu1 %v5130_v6 }
 0x82d   :  { %3183 = vmatpush3.msra.mxu1 %v4644_v50 }
 0x82e   :  { %3184 = vmatprep.subr.mxu1 %v5130_v6 }
 0x82f   :  { %3185 = vmatpush3.msra.mxu1 %v4648_v51 }
 0x830   :  { %3186 = vmatprep.subr.mxu1 %v5130_v6 }
 0x831   :  { %3187 = vmatpush3.msra.mxu1 %v4652_v52 }
 0x832   :  { %3188 = vmatprep.subr.mxu1 %v5130_v6 }
 0x833   :  { %3189 = vmatpush3.msra.mxu1 %v4656_v53 }
 0x834   :  { %3228 = vmatprep.subr.mxu1 %v5130_v6 }
 0x8b4   :  { %v1153_v54 = vpop.f32.mrf.mxu1 }
 0x8b6   :  { %v3052_v58 = vpop.f32.mrf.mxu1 }
 0x8b8   :  { %v1223_v60 = vpop.f32.mrf.mxu0 }
 0x8b9   :  { %v1224_v29 = vadd.f32 %v1223_v60, %v1153_v54 }
 0x8ba   :  { %v3087_v8 = vpop.f32.mrf.mxu0 }
 0x8bb   :  { %v1227_v31 = vadd.f32 %v4177_v44, %v1224_v29 }
 0x8bd   :  { %3546 = vtanh.f32 %v1227_v31 }
 0x8ca   :  { %v3547_v49 = vpop.eup %3546 }
 0x8cb   :  { %v1229_v58 = vmul.f32 %v3547_v49, %v5137_v21 }
 0x8cd   :  { %v1230_v44 = vadd.f32 %v1229_v58, %v5138_v0 }
 0x8d4   :  { %v1308_v51 = vpop.f32.mrf.mxu1 }
 0x8d5   :  { %v1309_v52 = vadd.f32 %v1308_v51, %v213_v28  ;;  %v1238_v28 = vmul.f32 %v1230_v44, %v4455_v23  ;;  %v5155_v23 = vld [vmem:[#allocation21_spill] sm:$0xff] }
 0x8d6   :  { %v3122_v50 = vpop.f32.mrf.mxu1 }
 0x8d7   :  { %3548 = vtanh.f32 %v1309_v52 }
 0x8e4   :  { %v3549_v48 = vpop.eup %3548 }
 0x8e5   :  { %v1313_v53 = vmul.f32 %v3549_v48, %v5137_v21 }
 0x8e7   :  { %v1314_v47 = vadd.f32 %v1313_v53, %v5138_v0 }
 0x8e9   :  { %1315 = vrot.lane.b32.xlu0 %v1314_v47, %s3707_s10  ;;  %v1322_v8 = vmul.f32 %v1314_v47, %v4451_v56 }
 0x8ed   :  { %1231 = vrot.lane.b32.xlu0 %v1230_v44, %s3707_s10 }
 0x95b   :  { %v1316_v54 = vpop.permute.xlu0 %1315 }
 0x95c   :  { %v1317_v60 = vmul.f32 %v1316_v54, %v1314_v47  ;;  %v5156_v47 = vld [vmem:[#allocation10_spill] sm:$0xff] }
 0x95e   :  { %v1318_v51 = vmul.f32 %v1317_v60, %v3978_v62 }
 0x95f   :  { %v1232_v50 = vpop.permute.xlu0 %1231 }
 0x960   :  { %v1233_v52 = vmul.f32 %v1232_v50, %v1230_v44  ;;  %1319 = vrot.lane.b32.xlu1 %v1318_v51, %s3708_s20  ;;  %v5157_v44 = vld [vmem:[#allocation11_spill] sm:$0xff] }
 0x962   :  { %v1234_v48 = vmul.f32 %v1233_v52, %v3978_v62 }
 0x964   :  { %1235 = vrot.lane.b32.xlu1 %v1234_v48, %s3708_s20 }
 0x9d2   :  { %v1320_v53 = vpop.permute.xlu1 %1319 }
 0x9d3   :  { %v1321_v49 = vadd.f32 %v1320_v53, %v1318_v51  ;;  %v5161_v53 = vld [vmem:[#allocation15_spill] sm:$0xff] }
 0x9d5   :  { %v4674_v29 = vadd.f32 %v1322_v8, %v1321_v49 }
 0x9d6   :  { %v1236_v31 = vpop.permute.xlu1 %1235 }
 0x9d7   :  { %3550 = vtanh.f32 %v4674_v29  ;;  %v1237_v40 = vadd.f32 %v1236_v31, %v1234_v48  ;;  %v5160_v48 = vld [vmem:[#allocation14_spill] sm:$0xff] }
 0x9d9   :  { %v4678_v58 = vadd.f32 %v1238_v28, %v1237_v40 }
 0x9db   :  { %3552 = vtanh.f32 %v4678_v58 }
 0x9e4   :  { %v3551_v60 = vpop.eup %3550 }
 0x9e5   :  { %v4681_v52 = vmul.f32 %v3551_v60, %v1316_v54  ;;  %v5158_v54 = vld [vmem:[#allocation12_spill] sm:$0xff]  ;;  %v4790_v60 = vld [vmem:[%s5071_s6] ss:$0 sm:$0xff] }
 0x9e6   :  { %5162 = vst [vmem:[#allocation16_spill] sm:$0xff] %v4790_v60 }
 0x9e7   :  { %3156 = vmatmul.mubr.f32.vlgmr.msra.gmra.mxu0 %v4681_v52 }
 0x9e8   :  { %v3553_v51 = vpop.eup %3552  ;;  %3194 = vmatpush3.msra.mxu0 %v4461_v61  ;;  %3225 = vmatprep.mubr.msk.f32.mxu0 %vm3705_vm0, %v5130_v6 }
 0x9e9   :  { %3195 = vmatprep.subr.mxu0 %v5130_v6  ;;  %v1241_v56 = vmul.f32 %v3553_v51, %v1232_v50  ;;  %v5159_v50 = vld [vmem:[#allocation13_spill] sm:$0xff] }
 0x9ea   :  { %3196 = vmatpush3.msra.mxu0 %v4467_v25 }
 0x9eb   :  { %3197 = vmatprep.subr.mxu0 %v5130_v6  ;;  %3191 = vmatmul.mubr.f32.vlgmr.msra.gmra.mxu1 %v1241_v56 }
 0x9ec   :  { %3198 = vmatpush3.msra.mxu0 %v4471_v57  ;;  %3229 = vmatpush3.msra.mxu1 %v4474_v26 }
 0x9ed   :  { %3199 = vmatprep.subr.mxu0 %v5130_v6  ;;  %3230 = vmatprep.subr.mxu1 %v5130_v6 }
 0x9ee   :  { %3200 = vmatpush3.msra.mxu0 %v4479_v22  ;;  %3231 = vmatpush3.msra.mxu1 %v4482_v41 }
 0x9ef   :  { %3201 = vmatprep.subr.mxu0 %v5130_v6  ;;  %3232 = vmatprep.subr.mxu1 %v5130_v6 }
 0x9f0   :  { %3202 = vmatpush3.msra.mxu0 %v4487_v7  ;;  %3233 = vmatpush3.msra.mxu1 %v4490_v46 }
 0x9f1   :  { %3203 = vmatprep.subr.mxu0 %v5130_v6  ;;  %3234 = vmatprep.subr.mxu1 %v5130_v6 }
 0x9f2   :  { %3204 = vmatpush3.msra.mxu0 %v4495_v24  ;;  %3235 = vmatpush3.msra.mxu1 %v4498_v55 }
 0x9f3   :  { %3205 = vmatprep.subr.mxu0 %v5130_v6  ;;  %3236 = vmatprep.subr.mxu1 %v5130_v6 }
 0x9f4   :  { %3206 = vmatpush3.msra.mxu0 %v4503_v1  ;;  %3237 = vmatpush3.msra.mxu1 %v4506_v63 }
 0x9f5   :  { %3207 = vmatprep.subr.mxu0 %v5130_v6  ;;  %3238 = vmatprep.subr.mxu1 %v5130_v6 }
 0x9f6   :  { %3208 = vmatpush3.msra.mxu0 %v4511_v30  ;;  %3239 = vmatpush3.msra.mxu1 %v4514_v27 }
 0x9f7   :  { %3209 = vmatprep.subr.mxu0 %v5130_v6  ;;  %3240 = vmatprep.subr.mxu1 %v5130_v6 }
 0x9f8   :  { %3210 = vmatpush3.msra.mxu0 %v4519_v36  ;;  %3241 = vmatpush3.msra.mxu1 %v4522_v59 }
 0x9f9   :  { %3211 = vmatprep.subr.mxu0 %v5130_v6  ;;  %3242 = vmatprep.subr.mxu1 %v5130_v6 }
 0x9fa   :  { %3212 = vmatpush3.msra.mxu0 %v4527_v2  ;;  %3243 = vmatpush3.msra.mxu1 %v4530_v3 }
 0x9fb   :  { %3213 = vmatprep.subr.mxu0 %v5130_v6  ;;  %3244 = vmatprep.subr.mxu1 %v5130_v6 }
 0x9fc   :  { %3214 = vmatpush3.msra.mxu0 %v4535_v4  ;;  %3245 = vmatpush3.msra.mxu1 %v4538_v5 }
 0x9fd   :  { %3215 = vmatprep.subr.mxu0 %v5130_v6  ;;  %3246 = vmatprep.subr.mxu1 %v5130_v6 }
 0x9fe   :  { %3216 = vmatpush3.msra.mxu0 %v4543_v9  ;;  %3247 = vmatpush3.msra.mxu1 %v4546_v10 }
 0x9ff   :  { %3217 = vmatprep.subr.mxu0 %v5130_v6  ;;  %3248 = vmatprep.subr.mxu1 %v5130_v6 }
 0xa00   :  { %3218 = vmatpush3.msra.mxu0 %v4551_v11  ;;  %3249 = vmatpush3.msra.mxu1 %v4554_v12 }
 0xa01   :  { %3219 = vmatprep.subr.mxu0 %v5130_v6  ;;  %3250 = vmatprep.subr.mxu1 %v5130_v6 }
 0xa02   :  { %3220 = vmatpush3.msra.mxu0 %v4559_v13  ;;  %3251 = vmatpush3.msra.mxu1 %v4562_v14 }
 0xa03   :  { %3221 = vmatprep.subr.mxu0 %v5130_v6  ;;  %3252 = vmatprep.subr.mxu1 %v5130_v6 }
 0xa04   :  { %3222 = vmatpush3.msra.mxu0 %v4567_v15  ;;  %3253 = vmatpush3.msra.mxu1 %v4570_v16 }
 0xa05   :  { %3223 = vmatprep.subr.mxu0 %v5130_v6  ;;  %3254 = vmatprep.subr.mxu1 %v5130_v6 }
 0xa06   :  { %3224 = vmatpush3.msra.mxu0 %v4575_v17  ;;  %3255 = vmatpush3.msra.mxu1 %v4578_v19 }
 0xa07   :  { %3226 = vmatmul.mubr.f32.vlgmr.msra.gmra.mxu0 %v4681_v52  ;;  %3263 = vmatprep.subr.mxu0 %v5130_v6 }
 0xa08   :  { %3264 = vmatpush3.msra.mxu0 %v4583_v20  ;;  %3295 = vmatprep.mubr.msk.f32.mxu0 %vm3705_vm0, %v5130_v6 }
 0xa09   :  { %3265 = vmatprep.subr.mxu0 %v5130_v6  ;;  %3256 = vmatprep.subr.mxu1 %v5130_v6 }
 0xa0a   :  { %3266 = vmatpush3.msra.mxu0 %v4591_v33  ;;  %3257 = vmatpush3.msra.mxu1 %v4588_v32 }
 0xa0b   :  { %3267 = vmatprep.subr.mxu0 %v5130_v6  ;;  %3258 = vmatprep.subr.mxu1 %v5130_v6 }
 0xa0c   :  { %3268 = vmatpush3.msra.mxu0 %v4599_v35  ;;  %3259 = vmatpush3.msra.mxu1 %v4596_v34 }
 0xa0d   :  { %3269 = vmatprep.subr.mxu0 %v5130_v6  ;;  %3260 = vmatprep.mubr.msk.f32.mxu1 %vm3705_vm0, %v5130_v6 }
 0xa0e   :  { %3270 = vmatpush3.msra.mxu0 %v4606_v37  ;;  %3298 = vmatprep.subr.mxu1 %v5130_v6 }
 0xa0f   :  { %3271 = vmatprep.subr.mxu0 %v5130_v6 }
 0xa10   :  { %3272 = vmatpush3.msra.mxu0 %v4612_v38 }
 0xa11   :  { %3273 = vmatprep.subr.mxu0 %v5130_v6 }
 0xa12   :  { %3274 = vmatpush3.msra.mxu0 %v4616_v39 }
 0xa13   :  { %3275 = vmatprep.subr.mxu0 %v5130_v6 }
 0xa14   :  { %3276 = vmatpush3.msra.mxu0 %v4620_v42 }
 0xa15   :  { %3277 = vmatprep.subr.mxu0 %v5130_v6 }
 0xa16   :  { %3278 = vmatpush3.msra.mxu0 %v4624_v43 }
 0xa17   :  { %3279 = vmatprep.subr.mxu0 %v5130_v6 }
 0xa18   :  { %3280 = vmatpush3.msra.mxu0 %v4628_v45 }
 0xa19   :  { %3281 = vmatprep.subr.mxu0 %v5130_v6 }
 0xa1a   :  { %3282 = vmatpush3.msra.mxu0 %v5155_v23 }
 0xa1b   :  { %3283 = vmatprep.subr.mxu0 %v5130_v6 }
 0xa1c   :  { %3284 = vmatpush3.msra.mxu0 %v5156_v47 }
 0xa1d   :  { %3285 = vmatprep.subr.mxu0 %v5130_v6 }
 0xa1e   :  { %3286 = vmatpush3.msra.mxu0 %v5157_v44 }
 0xa1f   :  { %3287 = vmatprep.subr.mxu0 %v5130_v6 }
 0xa20   :  { %3288 = vmatpush3.msra.mxu0 %v5158_v54 }
 0xa21   :  { %3289 = vmatprep.subr.mxu0 %v5130_v6 }
 0xa22   :  { %3290 = vmatpush3.msra.mxu0 %v5159_v50 }
 0xa23   :  { %3291 = vmatprep.subr.mxu0 %v5130_v6 }
 0xa24   :  { %3292 = vmatpush3.msra.mxu0 %v5160_v48  ;;  %v5163_v48 = vld [vmem:[#allocation22_spill] sm:$0xff] }
 0xa25   :  { %3293 = vmatprep.subr.mxu0 %v5130_v6 }
 0xa26   :  { %3294 = vmatpush3.msra.mxu0 %v5161_v53 }
 0xa27   :  { %3333 = vmatprep.subr.mxu0 %v5130_v6 }
 0xaa7   :  { %v1392_v49 = vpop.f32.mrf.mxu0 }
 0xaa9   :  { %v3157_v8 = vpop.f32.mrf.mxu0 }
 0xaaa   :  { %v218_v8 = vadd.f32 %v4436_v18, %v5163_v48 }
 0xaab   :  { %v1462_v31 = vpop.f32.mrf.mxu1 }
 0xaac   :  { %v1463_v40 = vadd.f32 %v1462_v31, %v1392_v49 }
 0xaad   :  { %v3192_v28 = vpop.f32.mrf.mxu1 }
 0xaae   :  { %v1466_v52 = vadd.f32 %v4790_v60, %v1463_v40 }
 0xab0   :  { %3554 = vtanh.f32 %v1466_v52 }
 0xabd   :  { %v3555_v51 = vpop.eup %3554 }
 0xabe   :  { %v1468_v56 = vmul.f32 %v3555_v51, %v5137_v21 }
 0xac0   :  { %v1469_v53 = vadd.f32 %v1468_v56, %v5138_v0 }
 0xac2   :  { %1470 = vrot.lane.b32.xlu1 %v1469_v53, %s3707_s10 }
 0xac7   :  { %v1547_v49 = vpop.f32.mrf.mxu0 }
 0xac8   :  { %v1548_v31 = vadd.f32 %v1547_v49, %v218_v8 }
 0xac9   :  { %v3227_v28 = vpop.f32.mrf.mxu0 }
 0xaca   :  { %3556 = vtanh.f32 %v1548_v31 }
 0xad7   :  { %v3557_v50 = vpop.eup %3556 }
 0xad8   :  { %v1552_v54 = vmul.f32 %v3557_v50, %v5137_v21  ;;  %v1477_v50 = vmul.f32 %v1469_v53, %v4678_v58 }
 0xada   :  { %v1553_v40 = vadd.f32 %v1552_v54, %v5138_v0 }
 0xadc   :  { %1554 = vrot.lane.b32.xlu0 %v1553_v40, %s3707_s10 }
 0xb34   :  { %v1471_v52 = vpop.permute.xlu1 %1470 }
 0xb35   :  { %v1472_v51 = vmul.f32 %v1471_v52, %v1469_v53  ;;  %v1561_v53 = vmul.f32 %v1553_v40, %v4674_v29 }
 0xb37   :  { %v1473_v56 = vmul.f32 %v1472_v51, %v3978_v62  ;;  %v5165_v51 = vld [vmem:[#allocation12_spill] sm:$0xff] }
 0xb39   :  { %1474 = vrot.lane.b32.xlu1 %v1473_v56, %s3708_s20 }
 0xb4e   :  { %v1555_v60 = vpop.permute.xlu0 %1554 }
 0xb4f   :  { %v1556_v44 = vmul.f32 %v1555_v60, %v1553_v40 }
 0xb51   :  { %v1557_v48 = vmul.f32 %v1556_v44, %v3978_v62 }
 0xb53   :  { %1558 = vrot.lane.b32.xlu0 %v1557_v48, %s3708_s20 }
 0xbab   :  { %v1475_v8 = vpop.permute.xlu1 %1474 }
 0xbac   :  { %v1476_v49 = vadd.f32 %v1475_v8, %v1473_v56  ;;  %v5166_v56 = vld [vmem:[#allocation13_spill] sm:$0xff]  ;;  %v5168_v8 = vld [vmem:[#allocation15_spill] sm:$0xff] }
 0xbae   :  { %v4806_v31 = vadd.f32 %v1477_v50, %v1476_v49 }
 0xbb0   :  { %3558 = vtanh.f32 %v4806_v31 }
 0xbbd   :  { %v3559_v54 = vpop.eup %3558 }
 0xbbe   :  { %v1480_v28 = vmul.f32 %v3559_v54, %v1471_v52 }
 0xbc0   :  { %3296 = vmatmul.mubr.f32.vlgmr.msra.gmra.mxu0 %v1480_v28 }
 0xbc1   :  { %3334 = vmatpush3.msra.mxu0 %v4474_v26  ;;  %3365 = vmatprep.mubr.msk.f32.mxu0 %vm3705_vm0, %v5130_v6 }
 0xbc2   :  { %3335 = vmatprep.subr.mxu0 %v5130_v6 }
 0xbc3   :  { %3336 = vmatpush3.msra.mxu0 %v4482_v41 }
 0xbc4   :  { %3337 = vmatprep.subr.mxu0 %v5130_v6 }
 0xbc5   :  { %v1559_v44 = vpop.permute.xlu0 %1558  ;;  %3338 = vmatpush3.msra.mxu0 %v4490_v46 }
 0xbc6   :  { %v1560_v58 = vadd.f32 %v1559_v44, %v1557_v48  ;;  %3339 = vmatprep.subr.mxu0 %v5130_v6  ;;  %v5167_v48 = vld [vmem:[#allocation14_spill] sm:$0xff] }
 0xbc7   :  { %3340 = vmatpush3.msra.mxu0 %v4498_v55 }
 0xbc8   :  { %v4819_v52 = vadd.f32 %v1561_v53, %v1560_v58  ;;  %3341 = vmatprep.subr.mxu0 %v5130_v6  ;;  %v5169_v58 = vld [vmem:[#allocation16_spill] sm:$0xff] }
 0xbc9   :  { %3342 = vmatpush3.msra.mxu0 %v4506_v63 }
 0xbca   :  { %3560 = vtanh.f32 %v4819_v52  ;;  %3343 = vmatprep.subr.mxu0 %v5130_v6 }
 0xbcb   :  { %3344 = vmatpush3.msra.mxu0 %v4514_v27 }
 0xbcc   :  { %3345 = vmatprep.subr.mxu0 %v5130_v6 }
 0xbcd   :  { %3346 = vmatpush3.msra.mxu0 %v4522_v59 }
 0xbce   :  { %3347 = vmatprep.subr.mxu0 %v5130_v6 }
 0xbcf   :  { %3348 = vmatpush3.msra.mxu0 %v4530_v3 }
 0xbd0   :  { %3349 = vmatprep.subr.mxu0 %v5130_v6 }
 0xbd1   :  { %3350 = vmatpush3.msra.mxu0 %v4538_v5 }
 0xbd2   :  { %3351 = vmatprep.subr.mxu0 %v5130_v6 }
 0xbd3   :  { %3352 = vmatpush3.msra.mxu0 %v4546_v10 }
 0xbd4   :  { %3353 = vmatprep.subr.mxu0 %v5130_v6 }
 0xbd5   :  { %3354 = vmatpush3.msra.mxu0 %v4554_v12 }
 0xbd6   :  { %3355 = vmatprep.subr.mxu0 %v5130_v6 }
 0xbd7   :  { %v3561_v29 = vpop.eup %3560  ;;  %3356 = vmatpush3.msra.mxu0 %v4562_v14 }
 0xbd8   :  { %v1564_v40 = vmul.f32 %v3561_v29, %v1555_v60  ;;  %3357 = vmatprep.subr.mxu0 %v5130_v6  ;;  %v5164_v60 = vld [vmem:[#allocation11_spill] sm:$0xff] }
 0xbd9   :  { %3358 = vmatpush3.msra.mxu0 %v4570_v16 }
 0xbda   :  { %3261 = vmatmul.mubr.f32.vlgmr.msra.gmra.mxu1 %v1564_v40  ;;  %3359 = vmatprep.subr.mxu0 %v5130_v6 }
 0xbdb   :  { %3299 = vmatpush3.msra.mxu1 %v4461_v61  ;;  %3330 = vmatprep.mubr.msk.f32.mxu1 %vm3705_vm0, %v5130_v6 }
 0xbdc   :  { %3300 = vmatprep.subr.mxu1 %v5130_v6  ;;  %3360 = vmatpush3.msra.mxu0 %v4578_v19 }
 0xbdd   :  { %3301 = vmatpush3.msra.mxu1 %v4467_v25  ;;  %3361 = vmatprep.subr.mxu0 %v5130_v6 }
 0xbde   :  { %3302 = vmatprep.subr.mxu1 %v5130_v6  ;;  %3362 = vmatpush3.msra.mxu0 %v4588_v32 }
 0xbdf   :  { %3303 = vmatpush3.msra.mxu1 %v4471_v57  ;;  %3363 = vmatprep.subr.mxu0 %v5130_v6 }
 0xbe0   :  { %3304 = vmatprep.subr.mxu1 %v5130_v6  ;;  %3364 = vmatpush3.msra.mxu0 %v4596_v34 }
 0xbe1   :  { %3305 = vmatpush3.msra.mxu1 %v4479_v22  ;;  %3403 = vmatprep.subr.mxu0 %v5130_v6 }
 0xbe2   :  { %3306 = vmatprep.subr.mxu1 %v5130_v6 }
 0xbe3   :  { %3307 = vmatpush3.msra.mxu1 %v4487_v7 }
 0xbe4   :  { %3308 = vmatprep.subr.mxu1 %v5130_v6 }
 0xbe5   :  { %3309 = vmatpush3.msra.mxu1 %v4495_v24 }
 0xbe6   :  { %3310 = vmatprep.subr.mxu1 %v5130_v6 }
 0xbe7   :  { %3311 = vmatpush3.msra.mxu1 %v4503_v1 }
 0xbe8   :  { %3312 = vmatprep.subr.mxu1 %v5130_v6 }
 0xbe9   :  { %3313 = vmatpush3.msra.mxu1 %v4511_v30 }
 0xbea   :  { %3314 = vmatprep.subr.mxu1 %v5130_v6 }
 0xbeb   :  { %3315 = vmatpush3.msra.mxu1 %v4519_v36 }
 0xbec   :  { %3316 = vmatprep.subr.mxu1 %v5130_v6 }
 0xbed   :  { %3317 = vmatpush3.msra.mxu1 %v4527_v2 }
 0xbee   :  { %3318 = vmatprep.subr.mxu1 %v5130_v6 }
 0xbef   :  { %3319 = vmatpush3.msra.mxu1 %v4535_v4 }
 0xbf0   :  { %3320 = vmatprep.subr.mxu1 %v5130_v6 }
 0xbf1   :  { %3321 = vmatpush3.msra.mxu1 %v4543_v9 }
 0xbf2   :  { %3322 = vmatprep.subr.mxu1 %v5130_v6 }
 0xbf3   :  { %3323 = vmatpush3.msra.mxu1 %v4551_v11 }
 0xbf4   :  { %3324 = vmatprep.subr.mxu1 %v5130_v6 }
 0xbf5   :  { %3325 = vmatpush3.msra.mxu1 %v4559_v13 }
 0xbf6   :  { %3326 = vmatprep.subr.mxu1 %v5130_v6 }
 0xbf7   :  { %3327 = vmatpush3.msra.mxu1 %v4567_v15 }
 0xbf8   :  { %3328 = vmatprep.subr.mxu1 %v5130_v6 }
 0xbf9   :  { %3329 = vmatpush3.msra.mxu1 %v4575_v17 }
 0xbfa   :  { %3331 = vmatmul.mubr.f32.vlgmr.msra.gmra.mxu1 %v1564_v40  ;;  %3368 = vmatprep.subr.mxu1 %v5130_v6 }
 0xbfb   :  { %3369 = vmatpush3.msra.mxu1 %v4583_v20  ;;  %3400 = vmatprep.mubr.msk.f32.mxu1 %vm3705_vm0, %v5130_v6 }
 0xbfc   :  { %3370 = vmatprep.subr.mxu1 %v5130_v6 }
 0xbfd   :  { %3371 = vmatpush3.msra.mxu1 %v4591_v33 }
 0xbfe   :  { %3372 = vmatprep.subr.mxu1 %v5130_v6 }
 0xbff   :  { %3373 = vmatpush3.msra.mxu1 %v4599_v35 }
 0xc00   :  { %3374 = vmatprep.subr.mxu1 %v5130_v6 }
 0xc01   :  { %3375 = vmatpush3.msra.mxu1 %v4606_v37 }
 0xc02   :  { %3376 = vmatprep.subr.mxu1 %v5130_v6 }
 0xc03   :  { %3377 = vmatpush3.msra.mxu1 %v4612_v38 }
 0xc04   :  { %3378 = vmatprep.subr.mxu1 %v5130_v6 }
 0xc05   :  { %3379 = vmatpush3.msra.mxu1 %v4616_v39 }
 0xc06   :  { %3380 = vmatprep.subr.mxu1 %v5130_v6 }
 0xc07   :  { %3381 = vmatpush3.msra.mxu1 %v4620_v42 }
 0xc08   :  { %3382 = vmatprep.subr.mxu1 %v5130_v6 }
 0xc09   :  { %3383 = vmatpush3.msra.mxu1 %v4624_v43 }
 0xc0a   :  { %3384 = vmatprep.subr.mxu1 %v5130_v6 }
 0xc0b   :  { %3385 = vmatpush3.msra.mxu1 %v4628_v45 }
 0xc0c   :  { %3386 = vmatprep.subr.mxu1 %v5130_v6 }
 0xc0d   :  { %3387 = vmatpush3.msra.mxu1 %v5155_v23 }
 0xc0e   :  { %3388 = vmatprep.subr.mxu1 %v5130_v6 }
 0xc0f   :  { %3389 = vmatpush3.msra.mxu1 %v5156_v47 }
 0xc10   :  { %3390 = vmatprep.subr.mxu1 %v5130_v6 }
 0xc11   :  { %3391 = vmatpush3.msra.mxu1 %v5164_v60 }
 0xc12   :  { %3392 = vmatprep.subr.mxu1 %v5130_v6 }
 0xc13   :  { %3393 = vmatpush3.msra.mxu1 %v5165_v51 }
 0xc14   :  { %3394 = vmatprep.subr.mxu1 %v5130_v6 }
 0xc15   :  { %3395 = vmatpush3.msra.mxu1 %v5166_v56 }
 0xc16   :  { %3396 = vmatprep.subr.mxu1 %v5130_v6 }
 0xc17   :  { %3397 = vmatpush3.msra.mxu1 %v5167_v48  ;;  %v5170_v48 = vld [vmem:[#allocation25_spill] sm:$0xff] }
 0xc18   :  { %3398 = vmatprep.subr.mxu1 %v5130_v6 }
 0xc19   :  { %3399 = vmatpush3.msra.mxu1 %v5168_v8  ;;  %v223_v8 = vadd.f32 %v4436_v18, %v5170_v48 }
 0xc1a   :  { %3438 = vmatprep.subr.mxu1 %v5130_v6 }
 0xc80   :  { %v1701_v49 = vpop.f32.mrf.mxu0 }
 0xc82   :  { %v3297_v50 = vpop.f32.mrf.mxu0 }
 0xc9a   :  { %v1631_v54 = vpop.f32.mrf.mxu1 }
 0xc9b   :  { %v1702_v28 = vadd.f32 %v1701_v49, %v1631_v54 }
 0xc9c   :  { %v3262_v44 = vpop.f32.mrf.mxu1 }
 0xc9d   :  { %v1705_v53 = vadd.f32 %v5169_v58, %v1702_v28 }
 0xc9f   :  { %3562 = vtanh.f32 %v1705_v53 }
 0xcac   :  { %v3563_v29 = vpop.eup %3562 }
 0xcad   :  { %v1707_v40 = vmul.f32 %v3563_v29, %v5137_v21 }
 0xcaf   :  { %v1708_v56 = vadd.f32 %v1707_v40, %v5138_v0 }
 0xcb1   :  { %1709 = vrot.lane.b32.xlu1 %v1708_v56, %s3707_s10 }
 0xcba   :  { %v1786_v51 = vpop.f32.mrf.mxu1 }
 0xcbb   :  { %v1787_v60 = vadd.f32 %v1786_v51, %v223_v8  ;;  %v1716_v51 = vmul.f32 %v1708_v56, %v4806_v31 }
 0xcbc   :  { %v3332_v47 = vpop.f32.mrf.mxu1 }
 0xcbd   :  { %3564 = vtanh.f32 %v1787_v60 }
 0xcca   :  { %v3565_v50 = vpop.eup %3564 }
 0xccb   :  { %v1791_v49 = vmul.f32 %v3565_v50, %v5137_v21 }
 0xccd   :  { %v1792_v54 = vadd.f32 %v1791_v49, %v5138_v0 }
 0xccf   :  { %1793 = vrot.lane.b32.xlu0 %v1792_v54, %s3707_s10 }
 0xd23   :  { %v1710_v28 = vpop.permute.xlu1 %1709 }
 0xd24   :  { %v1711_v44 = vmul.f32 %v1710_v28, %v1708_v56  ;;  %v1800_v56 = vmul.f32 %v1792_v54, %v4819_v52 }
 0xd26   :  { %v1712_v53 = vmul.f32 %v1711_v44, %v3978_v62 }
 0xd28   :  { %1713 = vrot.lane.b32.xlu1 %v1712_v53, %s3708_s20 }
 0xd41   :  { %v1794_v29 = vpop.permute.xlu0 %1793 }
 0xd42   :  { %v1795_v40 = vmul.f32 %v1794_v29, %v1792_v54 }
 0xd44   :  { %v1796_v18 = vmul.f32 %v1795_v40, %v3978_v62 }
 0xd46   :  { %1797 = vrot.lane.b32.xlu0 %v1796_v18, %s3708_s20 }
 0xd9a   :  { %v1714_v47 = vpop.permute.xlu1 %1713 }
 0xd9b   :  { %v1715_v60 = vadd.f32 %v1714_v47, %v1712_v53 }
 0xd9d   :  { %v4929_v48 = vadd.f32 %v1716_v51, %v1715_v60 }
 0xd9f   :  { %3566 = vtanh.f32 %v4929_v48 }
 0xdac   :  { %v3567_v8 = vpop.eup %3566 }
 0xdad   :  { %v1719_v50 = vmul.f32 %v3567_v8, %v1710_v28 }
 0xdaf   :  { %3401 = vmatmul.mubr.f32.vlgmr.msra.gmra.mxu1 %v1719_v50 }
 0xdb0   :  { %3439 = vmatpush3.msra.mxu1 %v4474_v26  ;;  %3470 = vmatprep.mubr.msk.f32.mxu1 %vm3705_vm0, %v5130_v6 }
 0xdb1   :  { %3440 = vmatprep.subr.mxu1 %v5130_v6 }
 0xdb2   :  { %3441 = vmatpush3.msra.mxu1 %v4482_v41 }
 0xdb3   :  { %3442 = vmatprep.subr.mxu1 %v5130_v6 }
 0xdb4   :  { %3443 = vmatpush3.msra.mxu1 %v4490_v46 }
 0xdb5   :  { %3444 = vmatprep.subr.mxu1 %v5130_v6 }
 0xdb6   :  { %3445 = vmatpush3.msra.mxu1 %v4498_v55 }
 0xdb7   :  { %3446 = vmatprep.subr.mxu1 %v5130_v6 }
 0xdb8   :  { %v1798_v31 = vpop.permute.xlu0 %1797  ;;  %3447 = vmatpush3.msra.mxu1 %v4506_v63 }
 0xdb9   :  { %v1799_v26 = vadd.f32 %v1798_v31, %v1796_v18  ;;  %3448 = vmatprep.subr.mxu1 %v5130_v6 }
 0xdba   :  { %3449 = vmatpush3.msra.mxu1 %v4514_v27 }
 0xdbb   :  { %v4946_v41 = vadd.f32 %v1800_v56, %v1799_v26  ;;  %3450 = vmatprep.subr.mxu1 %v5130_v6 }
 0xdbc   :  { %3451 = vmatpush3.msra.mxu1 %v4522_v59 }
 0xdbd   :  { %3568 = vtanh.f32 %v4946_v41  ;;  %3452 = vmatprep.subr.mxu1 %v5130_v6 }
 0xdbe   :  { %3453 = vmatpush3.msra.mxu1 %v4530_v3 }
 0xdbf   :  { %3454 = vmatprep.subr.mxu1 %v5130_v6 }
 0xdc0   :  { %3455 = vmatpush3.msra.mxu1 %v4538_v5  ;;  %v5177_v5 = vld [vmem:[#allocation24_spill] sm:$0xff] }
 0xdc1   :  { %3456 = vmatprep.subr.mxu1 %v5130_v6 }
 0xdc2   :  { %3457 = vmatpush3.msra.mxu1 %v4546_v10 }
 0xdc3   :  { %3458 = vmatprep.subr.mxu1 %v5130_v6 }
 0xdc4   :  { %3459 = vmatpush3.msra.mxu1 %v4554_v12 }
 0xdc5   :  { %3460 = vmatprep.subr.mxu1 %v5130_v6 }
 0xdc6   :  { %3461 = vmatpush3.msra.mxu1 %v4562_v14 }
 0xdc7   :  { %3462 = vmatprep.subr.mxu1 %v5130_v6 }
 0xdc8   :  { %3463 = vmatpush3.msra.mxu1 %v4570_v16 }
 0xdc9   :  { %3464 = vmatprep.subr.mxu1 %v5130_v6 }
 0xdca   :  { %v3569_v46 = vpop.eup %3568  ;;  %3465 = vmatpush3.msra.mxu1 %v4578_v19 }
 0xdcb   :  { %v1803_v55 = vmul.f32 %v3569_v46, %v1794_v29  ;;  %3466 = vmatprep.subr.mxu1 %v5130_v6 }
 0xdcc   :  { %3467 = vmatpush3.msra.mxu1 %v4588_v32 }
 0xdcd   :  { %3366 = vmatmul.mubr.f32.vlgmr.msra.gmra.mxu0 %v1803_v55  ;;  %3468 = vmatprep.subr.mxu1 %v5130_v6 }
 0xdce   :  { %3404 = vmatpush3.msra.mxu0 %v4461_v61  ;;  %3435 = vmatprep.mubr.msk.f32.mxu0 %vm3705_vm0, %v5130_v6  ;;  %v5171_v61 = vld [vmem:[#allocation10_spill] sm:$0xff] }
 0xdcf   :  { %3405 = vmatprep.subr.mxu0 %v5130_v6  ;;  %3469 = vmatpush3.msra.mxu1 %v4596_v34 }
 0xdd0   :  { %3406 = vmatpush3.msra.mxu0 %v4467_v25  ;;  %v5172_v25 = vld [vmem:[#allocation11_spill] sm:$0xff] }
 0xdd1   :  { %3407 = vmatprep.subr.mxu0 %v5130_v6 }
 0xdd2   :  { %3408 = vmatpush3.msra.mxu0 %v4471_v57  ;;  %v5173_v57 = vld [vmem:[#allocation12_spill] sm:$0xff] }
 0xdd3   :  { %3409 = vmatprep.subr.mxu0 %v5130_v6 }
 0xdd4   :  { %3410 = vmatpush3.msra.mxu0 %v4479_v22  ;;  %v5174_v22 = vld [vmem:[#allocation13_spill] sm:$0xff] }
 0xdd5   :  { %3411 = vmatprep.subr.mxu0 %v5130_v6 }
 0xdd6   :  { %3412 = vmatpush3.msra.mxu0 %v4487_v7  ;;  %v5175_v7 = vld [vmem:[#allocation14_spill] sm:$0xff] }
 0xdd7   :  { %3413 = vmatprep.subr.mxu0 %v5130_v6 }
 0xdd8   :  { %3414 = vmatpush3.msra.mxu0 %v4495_v24  ;;  %v5176_v24 = vld [vmem:[#allocation15_spill] sm:$0xff] }
 0xdd9   :  { %3415 = vmatprep.subr.mxu0 %v5130_v6 }
 0xdda   :  { %3416 = vmatpush3.msra.mxu0 %v4503_v1 }
 0xddb   :  { %3417 = vmatprep.subr.mxu0 %v5130_v6 }
 0xddc   :  { %3418 = vmatpush3.msra.mxu0 %v4511_v30 }
 0xddd   :  { %3419 = vmatprep.subr.mxu0 %v5130_v6 }
 0xdde   :  { %3420 = vmatpush3.msra.mxu0 %v4519_v36 }
 0xddf   :  { %3421 = vmatprep.subr.mxu0 %v5130_v6 }
 0xde0   :  { %3422 = vmatpush3.msra.mxu0 %v4527_v2 }
 0xde1   :  { %3423 = vmatprep.subr.mxu0 %v5130_v6 }
 0xde2   :  { %3424 = vmatpush3.msra.mxu0 %v4535_v4 }
 0xde3   :  { %3425 = vmatprep.subr.mxu0 %v5130_v6 }
 0xde4   :  { %3426 = vmatpush3.msra.mxu0 %v4543_v9 }
 0xde5   :  { %3427 = vmatprep.subr.mxu0 %v5130_v6 }
 0xde6   :  { %3428 = vmatpush3.msra.mxu0 %v4551_v11 }
 0xde7   :  { %3429 = vmatprep.subr.mxu0 %v5130_v6 }
 0xde8   :  { %3430 = vmatpush3.msra.mxu0 %v4559_v13 }
 0xde9   :  { %3431 = vmatprep.subr.mxu0 %v5130_v6 }
 0xdea   :  { %3432 = vmatpush3.msra.mxu0 %v4567_v15 }
 0xdeb   :  { %3433 = vmatprep.subr.mxu0 %v5130_v6 }
 0xdec   :  { %3434 = vmatpush3.msra.mxu0 %v4575_v17 }
 0xded   :  { %3436 = vmatmul.mubr.f32.vlgmr.msra.gmra.mxu0 %v1803_v55  ;;  %3473 = vmatprep.subr.mxu0 %v5130_v6  ;;  %v2236_v55 = vld [vmem:[#allocation2] ss:$0 sm:$0xff] }
 0xdee   :  { %3474 = vmatpush3.msra.mxu0 %v4583_v20  ;;  %3505 = vmatprep.mubr.msk.f32.mxu0 %vm3705_vm0, %v5130_v6 }
 0xdef   :  { %3475 = vmatprep.subr.mxu0 %v5130_v6 }
 0xdf0   :  { %3476 = vmatpush3.msra.mxu0 %v4591_v33 }
 0xdf1   :  { %3477 = vmatprep.subr.mxu0 %v5130_v6 }
 0xdf2   :  { %3478 = vmatpush3.msra.mxu0 %v4599_v35 }
 0xdf3   :  { %3479 = vmatprep.subr.mxu0 %v5130_v6 }
 0xdf4   :  { %3480 = vmatpush3.msra.mxu0 %v4606_v37 }
 0xdf5   :  { %3481 = vmatprep.subr.mxu0 %v5130_v6 }
 0xdf6   :  { %3482 = vmatpush3.msra.mxu0 %v4612_v38 }
 0xdf7   :  { %3483 = vmatprep.subr.mxu0 %v5130_v6 }
 0xdf8   :  { %3484 = vmatpush3.msra.mxu0 %v4616_v39 }
 0xdf9   :  { %3485 = vmatprep.subr.mxu0 %v5130_v6 }
 0xdfa   :  { %3486 = vmatpush3.msra.mxu0 %v4620_v42 }
 0xdfb   :  { %3487 = vmatprep.subr.mxu0 %v5130_v6 }
 0xdfc   :  { %3488 = vmatpush3.msra.mxu0 %v4624_v43 }
 0xdfd   :  { %3489 = vmatprep.subr.mxu0 %v5130_v6 }
 0xdfe   :  { %3490 = vmatpush3.msra.mxu0 %v4628_v45 }
 0xdff   :  { %3491 = vmatprep.subr.mxu0 %v5130_v6 }
 0xe00   :  { %3492 = vmatpush3.msra.mxu0 %v5155_v23 }
 0xe01   :  { %3493 = vmatprep.subr.mxu0 %v5130_v6 }
 0xe02   :  { %3494 = vmatpush3.msra.mxu0 %v5171_v61 }
 0xe03   :  { %3495 = vmatprep.subr.mxu0 %v5130_v6 }
 0xe04   :  { %3496 = vmatpush3.msra.mxu0 %v5172_v25 }
 0xe05   :  { %3497 = vmatprep.subr.mxu0 %v5130_v6 }
 0xe06   :  { %3498 = vmatpush3.msra.mxu0 %v5173_v57 }
 0xe07   :  { %3499 = vmatprep.subr.mxu0 %v5130_v6 }
 0xe08   :  { %3500 = vmatpush3.msra.mxu0 %v5174_v22 }
 0xe09   :  { %3501 = vmatprep.subr.mxu0 %v5130_v6 }
 0xe0a   :  { %3502 = vmatpush3.msra.mxu0 %v5175_v7 }
 0xe0b   :  { %3503 = vmatprep.subr.mxu0 %v5130_v6  ;;  %v3634_v6 = vld [vmem:[%s5068_s3] ss:$0 sm:$0xff] }
 0xe0c   :  { %3504 = vmatpush3.msra.mxu0 %v5176_v24  ;;  %v228_v9 = vadd.f32 %v3634_v6, %v5177_v5 }
 0xe6f   :  { %v1940_v1 = vpop.f32.mrf.mxu1 }
 0xe71   :  { %v3402_v63 = vpop.f32.mrf.mxu1 }
 0xe8d   :  { %v1870_v30 = vpop.f32.mrf.mxu0 }
 0xe8e   :  { %v1941_v27 = vadd.f32 %v1940_v1, %v1870_v30 }
 0xe8f   :  { %v3367_v36 = vpop.f32.mrf.mxu0 }
 0xe90   :  { %v1944_v59 = vadd.f32 %v5169_v58, %v1941_v27 }
 0xe92   :  { %3570 = vtanh.f32 %v1944_v59 }
 0xe9f   :  { %v3571_v2 = vpop.eup %3570 }
 0xea0   :  { %v1946_v3 = vmul.f32 %v3571_v2, %v5137_v21 }
 0xea2   :  { %v1947_v4 = vadd.f32 %v1946_v3, %v5138_v0 }
 0xea4   :  { %1948 = vrot.lane.b32.xlu0 %v1947_v4, %s3707_s10  ;;  %v1955_v37 = vmul.f32 %v1947_v4, %v4929_v48 }
 0xead   :  { %v2025_v10 = vpop.f32.mrf.mxu0 }
 0xeae   :  { %v2026_v11 = vadd.f32 %v2025_v10, %v228_v9 }
 0xeaf   :  { %v3437_v12 = vpop.f32.mrf.mxu0 }
 0xeb0   :  { %3572 = vtanh.f32 %v2026_v11 }
 0xebd   :  { %v3573_v13 = vpop.eup %3572 }
 0xebe   :  { %v2030_v14 = vmul.f32 %v3573_v13, %v5137_v21 }
 0xec0   :  { %v2031_v15 = vadd.f32 %v2030_v14, %v5138_v0 }
 0xec2   :  { %2032 = vrot.lane.b32.xlu1 %v2031_v15, %s3707_s10  ;;  %v2039_v23 = vmul.f32 %v2031_v15, %v4946_v41 }
 0xf16   :  { %v1949_v16 = vpop.permute.xlu0 %1948 }
 0xf17   :  { %v1950_v17 = vmul.f32 %v1949_v16, %v1947_v4 }
 0xf19   :  { %v1951_v19 = vmul.f32 %v1950_v17, %v3978_v62 }
 0xf1b   :  { %1952 = vrot.lane.b32.xlu0 %v1951_v19, %s3708_s20 }
 0xf34   :  { %v2033_v20 = vpop.permute.xlu1 %2032 }
 0xf35   :  { %v2034_v32 = vmul.f32 %v2033_v20, %v2031_v15 }
 0xf37   :  { %v2035_v33 = vmul.f32 %v2034_v32, %v3978_v62 }
 0xf39   :  { %2036 = vrot.lane.b32.xlu1 %v2035_v33, %s3708_s20 }
 0xf8d   :  { %v1953_v34 = vpop.permute.xlu0 %1952 }
 0xf8e   :  { %v1954_v35 = vadd.f32 %v1953_v34, %v1951_v19 }
 0xf90   :  { %v1956_v38 = vadd.f32 %v1955_v37, %v1954_v35 }
 0xf92   :  { %3574 = vtanh.f32 %v1956_v38 }
 0xf9f   :  { %v3575_v39 = vpop.eup %3574 }
 0xfa0   :  { %v1958_v42 = vmul.f32 %v3575_v39, %v1949_v16 }
 0xfa2   :  { %3506 = vmatmul.mubr.f32.vlgmr.msra.gmra.mxu0 %v1958_v42 }
 0xfab   :  { %v2037_v43 = vpop.permute.xlu1 %2036 }
 0xfac   :  { %v2038_v45 = vadd.f32 %v2037_v43, %v2035_v33 }
 0xfae   :  { %v2040_v52 = vadd.f32 %v2039_v23, %v2038_v45 }
 0xfb0   :  { %3576 = vtanh.f32 %v2040_v52 }
 0xfbd   :  { %v3577_v49 = vpop.eup %3576 }
 0xfbe   :  { %v2042_v54 = vmul.f32 %v3577_v49, %v2033_v20 }
 0xfc0   :  { %3471 = vmatmul.mubr.f32.vlgmr.msra.gmra.mxu1 %v2042_v54 }
0x1062   :  { %v2179_v28 = vpop.f32.mrf.mxu0 }
0x1064   :  { %v3507_v44 = vpop.f32.mrf.mxu0 }
0x1080   :  { %v2109_v53 = vpop.f32.mrf.mxu1 }
0x1081   :  { %v2180_v29 = vadd.f32 %v2179_v28, %v2109_v53 }
0x1082   :  { %v3472_v40 = vpop.f32.mrf.mxu1 }
0x1083   :  { %v2183_v18 = vadd.f32 %v5169_v58, %v2180_v29 }
0x1085   :  { %3578 = vtanh.f32 %v2183_v18 }
0x1092   :  { %v3579_v47 = vpop.eup %3578 }
0x1093   :  { %v2185_v60 = vmul.f32 %v3579_v47, %v5137_v21  ;;  %v2235_v21 = vld [vmem:[%s5072_s7] ss:$0 sm:$0xff] }
0x1095   :  { %v2186_v51 = vadd.f32 %v2185_v60, %v5138_v0 }
0x1097   :  { %2187 = vrot.lane.b32.xlu0 %v2186_v51, %s3707_s10  ;;  %v2194_v56 = vmul.f32 %v2186_v51, %v1956_v38 }
0x1109   :  { %v2188_v48 = vpop.permute.xlu0 %2187 }
0x110a   :  { %v2189_v8 = vmul.f32 %v2188_v48, %v2186_v51 }
0x110c   :  { %v2190_v50 = vmul.f32 %v2189_v8, %v3978_v62 }
0x110e   :  { %2191 = vrot.lane.b32.xlu1 %v2190_v50, %s3708_s20 }
0x1180   :  { %v2192_v31 = vpop.permute.xlu1 %2191 }
0x1181   :  { %v2193_v26 = vadd.f32 %v2192_v31, %v2190_v50 }
0x1183   :  { %v2195_v41 = vadd.f32 %v2194_v56, %v2193_v26 }
0x1185   :  { %3580 = vtanh.f32 %v2195_v41 }
0x1192   :  { %v3581_v58 = vpop.eup %3580 }
0x1193   :  { %v2197_v46 = vmul.f32 %v3581_v58, %v2188_v48 }
0x1195   :  { %v2205_v0 = vmul.f32 %v2235_v21, %v2197_v46 }
0x1197   :  { %2206 = vadd.xlane.f32.xlu0 %v2205_v0 }
0x1220   :  { %v2207_v61 = vpop.xlane.xlu0 %2206 }
0x1221   :  { %v2215_v25 = vadd.f32 %v2236_v55, %v2207_v61 }
0x1223   :  { %3582 = vtanh.f32 %v2215_v25 }
0x1230   :  { %v3583_v62 = vpop.eup %3582 }
0x1231   :  { %2218 = vst.msk [vmem:[%s5074_s9] sm:$0xff] %vm2217_vm7, %v3583_v62 }
0x1232   :  { %2223 = vsyncpa [#allocation4], 1 }
0x1233   :  { %2224 = vsyncpa [#allocation6], 1 }

</bundles_post_ra>
